<compile_context>
chip_gen: v6e
topology: v6e:2x2x1
jax: 0.10.0
libtpu: 0.0.40
codegen_flags: <defaults>
</compile_context>

<pallas_src>
import jax
import jax.numpy as jnp
from jax.experimental import pallas as pl
from jax.experimental.pallas import tpu as pltpu


def _full_spec(shape):
    """BlockSpec covering the whole array (no grid)."""
    return pl.BlockSpec(shape, lambda *_: (0,) * len(shape))


def _build_kernel(T, B, H, num_layers, n_seq):
    G = 4 * H

    def kernel(*refs):
        x_ref = refs[0]                                  # (T, B, D) bf16
        layer_refs = refs[1:1 + 3 * num_layers]          # (w_ih^T, w_hh^T, bias) per layer
        fcw_ref = refs[1 + 3 * num_layers]               # (H, 1) f32
        fcb_ref = refs[2 + 3 * num_layers]               # (1, 1) f32
        out_ref = refs[3 + 3 * num_layers]               # (B, 1) f32
        scr = refs[4 + 3 * num_layers:]
        seq_scr = scr[0] if n_seq else None              # (T, B, H) f32
        xproj_scr = scr[n_seq]                           # (T, B, 4H) f32

        def run_layer(inp_ref, cast_in, wih_ref, whh_ref, b_ref, write_seq):
            wih = wih_ref[...]                           # (In, 4H) bf16
            whh = whh_ref[...]                           # (H, 4H)  bf16
            # Hoist the bias broadcast out of the loops.
            bias = jnp.broadcast_to(b_ref[...], (B, G))  # (B, 4H) f32

            # Phase 1: input projections for every timestep. Independent of the
            # recurrence, so the MXU streams through them back-to-back.
            for t in range(T):
                x_t = inp_ref[t]
                if cast_in:
                    x_t = x_t.astype(jnp.bfloat16)
                xproj_scr[t] = (
                    jnp.dot(x_t, wih, preferred_element_type=jnp.float32)
                    + bias)

            # Phase 2: sequential recurrence (f32 state, f32 gate math,
            # bf16 MXU operands).
            h = jnp.zeros((B, H), jnp.float32)
            c = jnp.zeros((B, H), jnp.float32)
            for t in range(T):
                gates = xproj_scr[t] + jnp.dot(
                    h.astype(jnp.bfloat16), whh,
                    preferred_element_type=jnp.float32)   # (B, 4H) f32
                i_g = jax.nn.sigmoid(gates[:, 0 * H:1 * H])
                f_g = jax.nn.sigmoid(gates[:, 1 * H:2 * H])
                g_g = jnp.tanh(gates[:, 2 * H:3 * H])
                o_g = jax.nn.sigmoid(gates[:, 3 * H:4 * H])
                c = f_g * c + i_g * g_g
                h = o_g * jnp.tanh(c)
                if write_seq:
                    seq_scr[t] = h        # feeds the next layer; never leaves VMEM
            return h

        h_last = None
        for l in range(num_layers):
            wih_ref, whh_ref, b_ref = layer_refs[3 * l:3 * l + 3]
            is_last = (l == num_layers - 1)
            h_last = run_layer(
                inp_ref=x_ref if l == 0 else seq_scr,
                cast_in=(l != 0),          # layer-0 input is already bf16
                wih_ref=wih_ref, whh_ref=whh_ref, b_ref=b_ref,
                write_seq=not is_last)     # last layer's sequence is never stored

        # fc(lstm_out[:, -1, :]) -> (B, 1)
        out_ref[...] = (
            jnp.dot(h_last, fcw_ref[...], preferred_element_type=jnp.float32)
            + fcb_ref[...])

    return kernel


def lstm_predictor_forward(x_btd, params):
    """x_btd: (B, T, input_dim) batch-first, like the PyTorch module."""
    x_tbd = jnp.transpose(x_btd, (1, 0, 2))              # time-major (T, B, D)
    T, B, D = x_tbd.shape
    layers = params["lstm"]
    L = len(layers)
    H = layers[0]["w_hh"].shape[1]
    G = 4 * H

    inputs = [x_tbd.astype(jnp.bfloat16)]
    in_specs = [_full_spec((T, B, D))]
    flops = 2 * B * H                                     # fc
    for lyr in layers:
        wih_t = jnp.asarray(lyr["w_ih"].T, jnp.bfloat16)  # (In, 4H)
        whh_t = jnp.asarray(lyr["w_hh"].T, jnp.bfloat16)  # (H, 4H)
        bias = jnp.asarray((lyr["b_ih"] + lyr["b_hh"])[None, :], jnp.float32)
        inputs += [wih_t, whh_t, bias]
        in_specs += [_full_spec(wih_t.shape),
                     _full_spec(whh_t.shape),
                     _full_spec(bias.shape)]
        in_dim = lyr["w_ih"].shape[1]
        flops += 2 * T * B * (in_dim + H) * G

    fc_w_t = jnp.asarray(params["fc_w"].T, jnp.float32)   # (H, 1)
    fc_b = jnp.asarray(params["fc_b"][None, :], jnp.float32)  # (1, 1)
    inputs += [fc_w_t, fc_b]
    in_specs += [_full_spec(fc_w_t.shape), _full_spec(fc_b.shape)]

    n_seq = 1 if L > 1 else 0
    scratch_shapes = []
    if n_seq:
        scratch_shapes.append(pltpu.VMEM((T, B, H), jnp.float32))
    scratch_shapes.append(pltpu.VMEM((T, B, G), jnp.float32))

    transcendentals = 5 * T * B * H * L
    bytes_accessed = sum(int(a.size) * a.dtype.itemsize for a in inputs) + B * 4

    kernel = _build_kernel(T, B, H, L, n_seq)

    return pl.pallas_call(
        kernel,
        out_shape=jax.ShapeDtypeStruct((B, 1), jnp.float32),
        in_specs=in_specs,
        out_specs=_full_spec((B, 1)),
        scratch_shapes=scratch_shapes,
        compiler_params=pltpu.CompilerParams(
            vmem_limit_bytes=32 * 1024 * 1024),
        cost_estimate=pl.CostEstimate(
            flops=flops,
            transcendentals=transcendentals,
            bytes_accessed=bytes_accessed),
    )(*inputs)


# ---------------------------------------------------------------------------
# Parameter init (mimics PyTorch U(-1/sqrt(H), 1/sqrt(H))) and f32 reference.
# ---------------------------------------------------------------------------
def init_params(key, input_dim, hidden_dim, num_layers):
    params = {"lstm": []}
    bound = 1.0 / jnp.sqrt(jnp.asarray(hidden_dim, jnp.float32))
    for layer in range(num_layers):
        in_dim = input_dim if layer == 0 else hidden_dim
        key, k1, k2, k3, k4 = jax.random.split(key, 5)
        params["lstm"].append({
            "w_ih": jax.random.uniform(k1, (4 * hidden_dim, in_dim),
                                       jnp.float32, -bound, bound),
            "w_hh": jax.random.uniform(k2, (4 * hidden_dim, hidden_dim),
                                       jnp.float32, -bound, bound),
            "b_ih": jax.random.uniform(k3, (4 * hidden_dim,),
                                       jnp.float32, -bound, bound),
            "b_hh": jax.random.uniform(k4, (4 * hidden_dim,),
                                       jnp.float32, -bound, bound),
        })
    key, k5, k6 = jax.random.split(key, 3)
    params["fc_w"] = jax.random.uniform(k5, (1, hidden_dim),
                                        jnp.float32, -bound, bound)
    params["fc_b"] = jax.random.uniform(k6, (1,),
                                        jnp.float32, -bound, bound)
    return params


def _reference_forward(x_btd, params):
    """Pure-JAX f32 LSTM + Linear, matching the PyTorch module."""
    x = jnp.transpose(x_btd, (1, 0, 2)).astype(jnp.float32)   # (T, B, D)
    T, B, _ = x.shape
    for lyr in params["lstm"]:
        H = lyr["w_hh"].shape[1]
        h = jnp.zeros((B, H), jnp.float32)
        c = jnp.zeros((B, H), jnp.float32)
        outs = []
        for t in range(T):
            gates = (x[t] @ lyr["w_ih"].T + h @ lyr["w_hh"].T
                     + lyr["b_ih"] + lyr["b_hh"])
            i = jax.nn.sigmoid(gates[:, 0 * H:1 * H])
            f = jax.nn.sigmoid(gates[:, 1 * H:2 * H])
            g = jnp.tanh(gates[:, 2 * H:3 * H])
            o = jax.nn.sigmoid(gates[:, 3 * H:4 * H])
            c = f * c + i * g
            h = o * jnp.tanh(c)
            outs.append(h)
        x = jnp.stack(outs)
    return x[-1] @ params["fc_w"].T + params["fc_b"][None, :]


if __name__ == "__main__":
    B, T, INPUT_DIM, HIDDEN_DIM, NUM_LAYERS = 2, 8, 4, 32, 2

    key = jax.random.PRNGKey(0)
    key, xkey = jax.random.split(key)
    x = jax.random.normal(xkey, (B, T, INPUT_DIM), jnp.float32)
    params = init_params(key, INPUT_DIM, HIDDEN_DIM, NUM_LAYERS)

    fwd = jax.jit(lstm_predictor_forward)
    preds = jax.block_until_ready(fwd(x, params))
    assert preds.shape == (B, 1)

    ref = jax.block_until_ready(_reference_forward(x, params))
    max_err = float(jnp.max(jnp.abs(preds - ref)))
    assert max_err < 5e-2, f"max abs error vs f32 reference: {max_err}"

    print("KERNEL_OK")
</pallas_src>

<mosaic_0001>
module attributes {stable_mosaic.version = 11 : i64} {
  func.func @kernel(%arg0: memref<8x2x4xbf16, #tpu.memory_space<vmem>>, %arg1: memref<4x128xbf16, #tpu.memory_space<vmem>>, %arg2: memref<32x128xbf16, #tpu.memory_space<vmem>>, %arg3: memref<1x128xf32, #tpu.memory_space<vmem>>, %arg4: memref<32x128xbf16, #tpu.memory_space<vmem>>, %arg5: memref<32x128xbf16, #tpu.memory_space<vmem>>, %arg6: memref<1x128xf32, #tpu.memory_space<vmem>>, %arg7: memref<32x1xf32, #tpu.memory_space<vmem>>, %arg8: memref<1x1xf32, #tpu.memory_space<vmem>>, %arg9: memref<2x1xf32, #tpu.memory_space<vmem>>, %arg10: memref<8x2x32xf32, #tpu.memory_space<vmem>>, %arg11: memref<8x2x128xf32, #tpu.memory_space<vmem>>) attributes {dimension_semantics = [], scalar_prefetch = 0 : i64, scratch_operands = 2 : i64, tpu.core_type = #tpu.core_type<tc>} {
    %c0 = arith.constant 0 : index
    %c0_0 = arith.constant 0 : index
    %0 = vector.load %arg1[%c0, %c0_0] : memref<4x128xbf16, #tpu.memory_space<vmem>>, vector<4x128xbf16>
    %c0_1 = arith.constant 0 : index
    %c0_2 = arith.constant 0 : index
    %1 = vector.load %arg2[%c0_1, %c0_2] : memref<32x128xbf16, #tpu.memory_space<vmem>>, vector<32x128xbf16>
    %c0_3 = arith.constant 0 : index
    %c0_4 = arith.constant 0 : index
    %2 = vector.load %arg3[%c0_3, %c0_4] : memref<1x128xf32, #tpu.memory_space<vmem>>, vector<1x128xf32>
    %3 = vector.shape_cast %2 : vector<1x128xf32> to vector<1x128xf32>
    %4 = vector.broadcast %3 : vector<1x128xf32> to vector<2x128xf32>
    %c0_5 = arith.constant 0 : index
    %c0_6 = arith.constant 0 : index
    %c0_7 = arith.constant 0 : index
    %5 = vector.load %arg0[%c0_5, %c0_6, %c0_7] : memref<8x2x4xbf16, #tpu.memory_space<vmem>>, vector<1x2x4xbf16>
    %6 = vector.shape_cast %5 : vector<1x2x4xbf16> to vector<2x4xbf16>
    %cst = arith.constant dense<0.000000e+00> : vector<2x128xf32>
    %7 = tpu.matmul %6, %0, %cst {dimension_numbers = #tpu.dot_dimension_numbers<[1], [0], [0], [1], [0, 0, 1, 1], [], []>} : vector<2x4xbf16>, vector<4x128xbf16>, vector<2x128xf32> -> vector<2x128xf32>
    %8 = arith.addf %7, %4 : vector<2x128xf32>
    %c0_8 = arith.constant 0 : index
    %c0_9 = arith.constant 0 : index
    %c0_10 = arith.constant 0 : index
    %9 = vector.load %arg11[%c0_8, %c0_9, %c0_10] : memref<8x2x128xf32, #tpu.memory_space<vmem>>, vector<1x2x128xf32>
    %10 = vector.shape_cast %9 : vector<1x2x128xf32> to vector<2x128xf32>
    %11 = vector.shape_cast %8 : vector<2x128xf32> to vector<1x2x128xf32>
    tpu.vector_store %arg11[%c0_8, %c0_9, %c0_10], %11 {strides = array<i32>} : memref<8x2x128xf32, #tpu.memory_space<vmem>>, vector<1x2x128xf32>,
    %c1 = arith.constant 1 : index
    %c0_11 = arith.constant 0 : index
    %c0_12 = arith.constant 0 : index
    %12 = vector.load %arg0[%c1, %c0_11, %c0_12] : memref<8x2x4xbf16, #tpu.memory_space<vmem>>, vector<1x2x4xbf16>
    %13 = vector.shape_cast %12 : vector<1x2x4xbf16> to vector<2x4xbf16>
    %cst_13 = arith.constant dense<0.000000e+00> : vector<2x128xf32>
    %14 = tpu.matmul %13, %0, %cst_13 {dimension_numbers = #tpu.dot_dimension_numbers<[1], [0], [0], [1], [0, 0, 1, 1], [], []>} : vector<2x4xbf16>, vector<4x128xbf16>, vector<2x128xf32> -> vector<2x128xf32>
    %15 = arith.addf %14, %4 : vector<2x128xf32>
    %c1_14 = arith.constant 1 : index
    %c0_15 = arith.constant 0 : index
    %c0_16 = arith.constant 0 : index
    %16 = vector.load %arg11[%c1_14, %c0_15, %c0_16] : memref<8x2x128xf32, #tpu.memory_space<vmem>>, vector<1x2x128xf32>
    %17 = vector.shape_cast %16 : vector<1x2x128xf32> to vector<2x128xf32>
    %18 = vector.shape_cast %15 : vector<2x128xf32> to vector<1x2x128xf32>
    tpu.vector_store %arg11[%c1_14, %c0_15, %c0_16], %18 {strides = array<i32>} : memref<8x2x128xf32, #tpu.memory_space<vmem>>, vector<1x2x128xf32>,
    %c2 = arith.constant 2 : index
    %c0_17 = arith.constant 0 : index
    %c0_18 = arith.constant 0 : index
    %19 = vector.load %arg0[%c2, %c0_17, %c0_18] : memref<8x2x4xbf16, #tpu.memory_space<vmem>>, vector<1x2x4xbf16>
    %20 = vector.shape_cast %19 : vector<1x2x4xbf16> to vector<2x4xbf16>
    %cst_19 = arith.constant dense<0.000000e+00> : vector<2x128xf32>
    %21 = tpu.matmul %20, %0, %cst_19 {dimension_numbers = #tpu.dot_dimension_numbers<[1], [0], [0], [1], [0, 0, 1, 1], [], []>} : vector<2x4xbf16>, vector<4x128xbf16>, vector<2x128xf32> -> vector<2x128xf32>
    %22 = arith.addf %21, %4 : vector<2x128xf32>
    %c2_20 = arith.constant 2 : index
    %c0_21 = arith.constant 0 : index
    %c0_22 = arith.constant 0 : index
    %23 = vector.load %arg11[%c2_20, %c0_21, %c0_22] : memref<8x2x128xf32, #tpu.memory_space<vmem>>, vector<1x2x128xf32>
    %24 = vector.shape_cast %23 : vector<1x2x128xf32> to vector<2x128xf32>
    %25 = vector.shape_cast %22 : vector<2x128xf32> to vector<1x2x128xf32>
    tpu.vector_store %arg11[%c2_20, %c0_21, %c0_22], %25 {strides = array<i32>} : memref<8x2x128xf32, #tpu.memory_space<vmem>>, vector<1x2x128xf32>,
    %c3 = arith.constant 3 : index
    %c0_23 = arith.constant 0 : index
    %c0_24 = arith.constant 0 : index
    %26 = vector.load %arg0[%c3, %c0_23, %c0_24] : memref<8x2x4xbf16, #tpu.memory_space<vmem>>, vector<1x2x4xbf16>
    %27 = vector.shape_cast %26 : vector<1x2x4xbf16> to vector<2x4xbf16>
    %cst_25 = arith.constant dense<0.000000e+00> : vector<2x128xf32>
    %28 = tpu.matmul %27, %0, %cst_25 {dimension_numbers = #tpu.dot_dimension_numbers<[1], [0], [0], [1], [0, 0, 1, 1], [], []>} : vector<2x4xbf16>, vector<4x128xbf16>, vector<2x128xf32> -> vector<2x128xf32>
    %29 = arith.addf %28, %4 : vector<2x128xf32>
    %c3_26 = arith.constant 3 : index
    %c0_27 = arith.constant 0 : index
    %c0_28 = arith.constant 0 : index
    %30 = vector.load %arg11[%c3_26, %c0_27, %c0_28] : memref<8x2x128xf32, #tpu.memory_space<vmem>>, vector<1x2x128xf32>
    %31 = vector.shape_cast %30 : vector<1x2x128xf32> to vector<2x128xf32>
    %32 = vector.shape_cast %29 : vector<2x128xf32> to vector<1x2x128xf32>
    tpu.vector_store %arg11[%c3_26, %c0_27, %c0_28], %32 {strides = array<i32>} : memref<8x2x128xf32, #tpu.memory_space<vmem>>, vector<1x2x128xf32>,
    %c4 = arith.constant 4 : index
    %c0_29 = arith.constant 0 : index
    %c0_30 = arith.constant 0 : index
    %33 = vector.load %arg0[%c4, %c0_29, %c0_30] : memref<8x2x4xbf16, #tpu.memory_space<vmem>>, vector<1x2x4xbf16>
    %34 = vector.shape_cast %33 : vector<1x2x4xbf16> to vector<2x4xbf16>
    %cst_31 = arith.constant dense<0.000000e+00> : vector<2x128xf32>
    %35 = tpu.matmul %34, %0, %cst_31 {dimension_numbers = #tpu.dot_dimension_numbers<[1], [0], [0], [1], [0, 0, 1, 1], [], []>} : vector<2x4xbf16>, vector<4x128xbf16>, vector<2x128xf32> -> vector<2x128xf32>
    %36 = arith.addf %35, %4 : vector<2x128xf32>
    %c4_32 = arith.constant 4 : index
    %c0_33 = arith.constant 0 : index
    %c0_34 = arith.constant 0 : index
    %37 = vector.load %arg11[%c4_32, %c0_33, %c0_34] : memref<8x2x128xf32, #tpu.memory_space<vmem>>, vector<1x2x128xf32>
    %38 = vector.shape_cast %37 : vector<1x2x128xf32> to vector<2x128xf32>
    %39 = vector.shape_cast %36 : vector<2x128xf32> to vector<1x2x128xf32>
    tpu.vector_store %arg11[%c4_32, %c0_33, %c0_34], %39 {strides = array<i32>} : memref<8x2x128xf32, #tpu.memory_space<vmem>>, vector<1x2x128xf32>,
    %c5 = arith.constant 5 : index
    %c0_35 = arith.constant 0 : index
    %c0_36 = arith.constant 0 : index
    %40 = vector.load %arg0[%c5, %c0_35, %c0_36] : memref<8x2x4xbf16, #tpu.memory_space<vmem>>, vector<1x2x4xbf16>
    %41 = vector.shape_cast %40 : vector<1x2x4xbf16> to vector<2x4xbf16>
    %cst_37 = arith.constant dense<0.000000e+00> : vector<2x128xf32>
    %42 = tpu.matmul %41, %0, %cst_37 {dimension_numbers = #tpu.dot_dimension_numbers<[1], [0], [0], [1], [0, 0, 1, 1], [], []>} : vector<2x4xbf16>, vector<4x128xbf16>, vector<2x128xf32> -> vector<2x128xf32>
    %43 = arith.addf %42, %4 : vector<2x128xf32>
    %c5_38 = arith.constant 5 : index
    %c0_39 = arith.constant 0 : index
    %c0_40 = arith.constant 0 : index
    %44 = vector.load %arg11[%c5_38, %c0_39, %c0_40] : memref<8x2x128xf32, #tpu.memory_space<vmem>>, vector<1x2x128xf32>
    %45 = vector.shape_cast %44 : vector<1x2x128xf32> to vector<2x128xf32>
    %46 = vector.shape_cast %43 : vector<2x128xf32> to vector<1x2x128xf32>
    tpu.vector_store %arg11[%c5_38, %c0_39, %c0_40], %46 {strides = array<i32>} : memref<8x2x128xf32, #tpu.memory_space<vmem>>, vector<1x2x128xf32>,
    %c6 = arith.constant 6 : index
    %c0_41 = arith.constant 0 : index
    %c0_42 = arith.constant 0 : index
    %47 = vector.load %arg0[%c6, %c0_41, %c0_42] : memref<8x2x4xbf16, #tpu.memory_space<vmem>>, vector<1x2x4xbf16>
    %48 = vector.shape_cast %47 : vector<1x2x4xbf16> to vector<2x4xbf16>
    %cst_43 = arith.constant dense<0.000000e+00> : vector<2x128xf32>
    %49 = tpu.matmul %48, %0, %cst_43 {dimension_numbers = #tpu.dot_dimension_numbers<[1], [0], [0], [1], [0, 0, 1, 1], [], []>} : vector<2x4xbf16>, vector<4x128xbf16>, vector<2x128xf32> -> vector<2x128xf32>
    %50 = arith.addf %49, %4 : vector<2x128xf32>
    %c6_44 = arith.constant 6 : index
    %c0_45 = arith.constant 0 : index
    %c0_46 = arith.constant 0 : index
    %51 = vector.load %arg11[%c6_44, %c0_45, %c0_46] : memref<8x2x128xf32, #tpu.memory_space<vmem>>, vector<1x2x128xf32>
    %52 = vector.shape_cast %51 : vector<1x2x128xf32> to vector<2x128xf32>
    %53 = vector.shape_cast %50 : vector<2x128xf32> to vector<1x2x128xf32>
    tpu.vector_store %arg11[%c6_44, %c0_45, %c0_46], %53 {strides = array<i32>} : memref<8x2x128xf32, #tpu.memory_space<vmem>>, vector<1x2x128xf32>,
    %c7 = arith.constant 7 : index
    %c0_47 = arith.constant 0 : index
    %c0_48 = arith.constant 0 : index
    %54 = vector.load %arg0[%c7, %c0_47, %c0_48] : memref<8x2x4xbf16, #tpu.memory_space<vmem>>, vector<1x2x4xbf16>
    %55 = vector.shape_cast %54 : vector<1x2x4xbf16> to vector<2x4xbf16>
    %cst_49 = arith.constant dense<0.000000e+00> : vector<2x128xf32>
    %56 = tpu.matmul %55, %0, %cst_49 {dimension_numbers = #tpu.dot_dimension_numbers<[1], [0], [0], [1], [0, 0, 1, 1], [], []>} : vector<2x4xbf16>, vector<4x128xbf16>, vector<2x128xf32> -> vector<2x128xf32>
    %57 = arith.addf %56, %4 : vector<2x128xf32>
    %c7_50 = arith.constant 7 : index
    %c0_51 = arith.constant 0 : index
    %c0_52 = arith.constant 0 : index
    %58 = vector.load %arg11[%c7_50, %c0_51, %c0_52] : memref<8x2x128xf32, #tpu.memory_space<vmem>>, vector<1x2x128xf32>
    %59 = vector.shape_cast %58 : vector<1x2x128xf32> to vector<2x128xf32>
    %60 = vector.shape_cast %57 : vector<2x128xf32> to vector<1x2x128xf32>
    tpu.vector_store %arg11[%c7_50, %c0_51, %c0_52], %60 {strides = array<i32>} : memref<8x2x128xf32, #tpu.memory_space<vmem>>, vector<1x2x128xf32>,
    %cst_53 = arith.constant 0.000000e+00 : f32
    %61 = vector.broadcast %cst_53 : f32 to vector<2x32xf32>
    %cst_54 = arith.constant 0.000000e+00 : f32
    %62 = vector.broadcast %cst_54 : f32 to vector<2x32xf32>
    %c0_55 = arith.constant 0 : index
    %c0_56 = arith.constant 0 : index
    %c0_57 = arith.constant 0 : index
    %63 = vector.load %arg11[%c0_55, %c0_56, %c0_57] : memref<8x2x128xf32, #tpu.memory_space<vmem>>, vector<1x2x128xf32>
    %64 = vector.shape_cast %63 : vector<1x2x128xf32> to vector<2x128xf32>
    %65 = arith.truncf %61 : vector<2x32xf32> to vector<2x32xbf16>
    %cst_58 = arith.constant dense<0.000000e+00> : vector<2x128xf32>
    %66 = tpu.matmul %65, %1, %cst_58 {dimension_numbers = #tpu.dot_dimension_numbers<[1], [0], [0], [1], [0, 0, 1, 1], [], []>} : vector<2x32xbf16>, vector<32x128xbf16>, vector<2x128xf32> -> vector<2x128xf32>
    %67 = arith.addf %64, %66 : vector<2x128xf32>
    %68 = vector.extract_strided_slice %67 {offsets = [0, 0], sizes = [2, 32], strides = [1, 1]} : vector<2x128xf32> to vector<2x32xf32>
    %69 = arith.negf %68 : vector<2x32xf32>
    %70 = math.exp %69 : vector<2x32xf32>
    %cst_59 = arith.constant 1.000000e+00 : f32
    %71 = vector.broadcast %cst_59 : f32 to vector<2x32xf32>
    %72 = arith.addf %71, %70 : vector<2x32xf32>
    %73 = arith.divf %71, %72 : vector<2x32xf32>
    %74 = vector.extract_strided_slice %67 {offsets = [0, 32], sizes = [2, 32], strides = [1, 1]} : vector<2x128xf32> to vector<2x32xf32>
    %75 = arith.negf %74 : vector<2x32xf32>
    %76 = math.exp %75 : vector<2x32xf32>
    %cst_60 = arith.constant 1.000000e+00 : f32
    %77 = vector.broadcast %cst_60 : f32 to vector<2x32xf32>
    %78 = arith.addf %77, %76 : vector<2x32xf32>
    %79 = arith.divf %77, %78 : vector<2x32xf32>
    %80 = vector.extract_strided_slice %67 {offsets = [0, 64], sizes = [2, 32], strides = [1, 1]} : vector<2x128xf32> to vector<2x32xf32>
    %81 = math.tanh %80 : vector<2x32xf32>
    %82 = vector.extract_strided_slice %67 {offsets = [0, 96], sizes = [2, 32], strides = [1, 1]} : vector<2x128xf32> to vector<2x32xf32>
    %83 = arith.negf %82 : vector<2x32xf32>
    %84 = math.exp %83 : vector<2x32xf32>
    %cst_61 = arith.constant 1.000000e+00 : f32
    %85 = vector.broadcast %cst_61 : f32 to vector<2x32xf32>
    %86 = arith.addf %85, %84 : vector<2x32xf32>
    %87 = arith.divf %85, %86 : vector<2x32xf32>
    %88 = arith.mulf %79, %62 : vector<2x32xf32>
    %89 = arith.mulf %73, %81 : vector<2x32xf32>
    %90 = arith.addf %88, %89 : vector<2x32xf32>
    %91 = math.tanh %90 : vector<2x32xf32>
    %92 = arith.mulf %87, %91 : vector<2x32xf32>
    %c0_62 = arith.constant 0 : index
    %c0_63 = arith.constant 0 : index
    %c0_64 = arith.constant 0 : index
    %93 = vector.load %arg10[%c0_62, %c0_63, %c0_64] : memref<8x2x32xf32, #tpu.memory_space<vmem>>, vector<1x2x32xf32>
    %94 = vector.shape_cast %93 : vector<1x2x32xf32> to vector<2x32xf32>
    %95 = vector.shape_cast %92 : vector<2x32xf32> to vector<1x2x32xf32>
    tpu.vector_store %arg10[%c0_62, %c0_63, %c0_64], %95 {strides = array<i32>} : memref<8x2x32xf32, #tpu.memory_space<vmem>>, vector<1x2x32xf32>,
    %c1_65 = arith.constant 1 : index
    %c0_66 = arith.constant 0 : index
    %c0_67 = arith.constant 0 : index
    %96 = vector.load %arg11[%c1_65, %c0_66, %c0_67] : memref<8x2x128xf32, #tpu.memory_space<vmem>>, vector<1x2x128xf32>
    %97 = vector.shape_cast %96 : vector<1x2x128xf32> to vector<2x128xf32>
    %98 = arith.truncf %92 : vector<2x32xf32> to vector<2x32xbf16>
    %cst_68 = arith.constant dense<0.000000e+00> : vector<2x128xf32>
    %99 = tpu.matmul %98, %1, %cst_68 {dimension_numbers = #tpu.dot_dimension_numbers<[1], [0], [0], [1], [0, 0, 1, 1], [], []>} : vector<2x32xbf16>, vector<32x128xbf16>, vector<2x128xf32> -> vector<2x128xf32>
    %100 = arith.addf %97, %99 : vector<2x128xf32>
    %101 = vector.extract_strided_slice %100 {offsets = [0, 0], sizes = [2, 32], strides = [1, 1]} : vector<2x128xf32> to vector<2x32xf32>
    %102 = arith.negf %101 : vector<2x32xf32>
    %103 = math.exp %102 : vector<2x32xf32>
    %cst_69 = arith.constant 1.000000e+00 : f32
    %104 = vector.broadcast %cst_69 : f32 to vector<2x32xf32>
    %105 = arith.addf %104, %103 : vector<2x32xf32>
    %106 = arith.divf %104, %105 : vector<2x32xf32>
    %107 = vector.extract_strided_slice %100 {offsets = [0, 32], sizes = [2, 32], strides = [1, 1]} : vector<2x128xf32> to vector<2x32xf32>
    %108 = arith.negf %107 : vector<2x32xf32>
    %109 = math.exp %108 : vector<2x32xf32>
    %cst_70 = arith.constant 1.000000e+00 : f32
    %110 = vector.broadcast %cst_70 : f32 to vector<2x32xf32>
    %111 = arith.addf %110, %109 : vector<2x32xf32>
    %112 = arith.divf %110, %111 : vector<2x32xf32>
    %113 = vector.extract_strided_slice %100 {offsets = [0, 64], sizes = [2, 32], strides = [1, 1]} : vector<2x128xf32> to vector<2x32xf32>
    %114 = math.tanh %113 : vector<2x32xf32>
    %115 = vector.extract_strided_slice %100 {offsets = [0, 96], sizes = [2, 32], strides = [1, 1]} : vector<2x128xf32> to vector<2x32xf32>
    %116 = arith.negf %115 : vector<2x32xf32>
    %117 = math.exp %116 : vector<2x32xf32>
    %cst_71 = arith.constant 1.000000e+00 : f32
    %118 = vector.broadcast %cst_71 : f32 to vector<2x32xf32>
    %119 = arith.addf %118, %117 : vector<2x32xf32>
    %120 = arith.divf %118, %119 : vector<2x32xf32>
    %121 = arith.mulf %112, %90 : vector<2x32xf32>
    %122 = arith.mulf %106, %114 : vector<2x32xf32>
    %123 = arith.addf %121, %122 : vector<2x32xf32>
    %124 = math.tanh %123 : vector<2x32xf32>
    %125 = arith.mulf %120, %124 : vector<2x32xf32>
    %c1_72 = arith.constant 1 : index
    %c0_73 = arith.constant 0 : index
    %c0_74 = arith.constant 0 : index
    %126 = vector.load %arg10[%c1_72, %c0_73, %c0_74] : memref<8x2x32xf32, #tpu.memory_space<vmem>>, vector<1x2x32xf32>
    %127 = vector.shape_cast %126 : vector<1x2x32xf32> to vector<2x32xf32>
    %128 = vector.shape_cast %125 : vector<2x32xf32> to vector<1x2x32xf32>
    tpu.vector_store %arg10[%c1_72, %c0_73, %c0_74], %128 {strides = array<i32>} : memref<8x2x32xf32, #tpu.memory_space<vmem>>, vector<1x2x32xf32>,
    %c2_75 = arith.constant 2 : index
    %c0_76 = arith.constant 0 : index
    %c0_77 = arith.constant 0 : index
    %129 = vector.load %arg11[%c2_75, %c0_76, %c0_77] : memref<8x2x128xf32, #tpu.memory_space<vmem>>, vector<1x2x128xf32>
    %130 = vector.shape_cast %129 : vector<1x2x128xf32> to vector<2x128xf32>
    %131 = arith.truncf %125 : vector<2x32xf32> to vector<2x32xbf16>
    %cst_78 = arith.constant dense<0.000000e+00> : vector<2x128xf32>
    %132 = tpu.matmul %131, %1, %cst_78 {dimension_numbers = #tpu.dot_dimension_numbers<[1], [0], [0], [1], [0, 0, 1, 1], [], []>} : vector<2x32xbf16>, vector<32x128xbf16>, vector<2x128xf32> -> vector<2x128xf32>
    %133 = arith.addf %130, %132 : vector<2x128xf32>
    %134 = vector.extract_strided_slice %133 {offsets = [0, 0], sizes = [2, 32], strides = [1, 1]} : vector<2x128xf32> to vector<2x32xf32>
    %135 = arith.negf %134 : vector<2x32xf32>
    %136 = math.exp %135 : vector<2x32xf32>
    %cst_79 = arith.constant 1.000000e+00 : f32
    %137 = vector.broadcast %cst_79 : f32 to vector<2x32xf32>
    %138 = arith.addf %137, %136 : vector<2x32xf32>
    %139 = arith.divf %137, %138 : vector<2x32xf32>
    %140 = vector.extract_strided_slice %133 {offsets = [0, 32], sizes = [2, 32], strides = [1, 1]} : vector<2x128xf32> to vector<2x32xf32>
    %141 = arith.negf %140 : vector<2x32xf32>
    %142 = math.exp %141 : vector<2x32xf32>
    %cst_80 = arith.constant 1.000000e+00 : f32
    %143 = vector.broadcast %cst_80 : f32 to vector<2x32xf32>
    %144 = arith.addf %143, %142 : vector<2x32xf32>
    %145 = arith.divf %143, %144 : vector<2x32xf32>
    %146 = vector.extract_strided_slice %133 {offsets = [0, 64], sizes = [2, 32], strides = [1, 1]} : vector<2x128xf32> to vector<2x32xf32>
    %147 = math.tanh %146 : vector<2x32xf32>
    %148 = vector.extract_strided_slice %133 {offsets = [0, 96], sizes = [2, 32], strides = [1, 1]} : vector<2x128xf32> to vector<2x32xf32>
    %149 = arith.negf %148 : vector<2x32xf32>
    %150 = math.exp %149 : vector<2x32xf32>
    %cst_81 = arith.constant 1.000000e+00 : f32
    %151 = vector.broadcast %cst_81 : f32 to vector<2x32xf32>
    %152 = arith.addf %151, %150 : vector<2x32xf32>
    %153 = arith.divf %151, %152 : vector<2x32xf32>
    %154 = arith.mulf %145, %123 : vector<2x32xf32>
    %155 = arith.mulf %139, %147 : vector<2x32xf32>
    %156 = arith.addf %154, %155 : vector<2x32xf32>
    %157 = math.tanh %156 : vector<2x32xf32>
    %158 = arith.mulf %153, %157 : vector<2x32xf32>
    %c2_82 = arith.constant 2 : index
    %c0_83 = arith.constant 0 : index
    %c0_84 = arith.constant 0 : index
    %159 = vector.load %arg10[%c2_82, %c0_83, %c0_84] : memref<8x2x32xf32, #tpu.memory_space<vmem>>, vector<1x2x32xf32>
    %160 = vector.shape_cast %159 : vector<1x2x32xf32> to vector<2x32xf32>
    %161 = vector.shape_cast %158 : vector<2x32xf32> to vector<1x2x32xf32>
    tpu.vector_store %arg10[%c2_82, %c0_83, %c0_84], %161 {strides = array<i32>} : memref<8x2x32xf32, #tpu.memory_space<vmem>>, vector<1x2x32xf32>,
    %c3_85 = arith.constant 3 : index
    %c0_86 = arith.constant 0 : index
    %c0_87 = arith.constant 0 : index
    %162 = vector.load %arg11[%c3_85, %c0_86, %c0_87] : memref<8x2x128xf32, #tpu.memory_space<vmem>>, vector<1x2x128xf32>
    %163 = vector.shape_cast %162 : vector<1x2x128xf32> to vector<2x128xf32>
    %164 = arith.truncf %158 : vector<2x32xf32> to vector<2x32xbf16>
    %cst_88 = arith.constant dense<0.000000e+00> : vector<2x128xf32>
    %165 = tpu.matmul %164, %1, %cst_88 {dimension_numbers = #tpu.dot_dimension_numbers<[1], [0], [0], [1], [0, 0, 1, 1], [], []>} : vector<2x32xbf16>, vector<32x128xbf16>, vector<2x128xf32> -> vector<2x128xf32>
    %166 = arith.addf %163, %165 : vector<2x128xf32>
    %167 = vector.extract_strided_slice %166 {offsets = [0, 0], sizes = [2, 32], strides = [1, 1]} : vector<2x128xf32> to vector<2x32xf32>
    %168 = arith.negf %167 : vector<2x32xf32>
    %169 = math.exp %168 : vector<2x32xf32>
    %cst_89 = arith.constant 1.000000e+00 : f32
    %170 = vector.broadcast %cst_89 : f32 to vector<2x32xf32>
    %171 = arith.addf %170, %169 : vector<2x32xf32>
    %172 = arith.divf %170, %171 : vector<2x32xf32>
    %173 = vector.extract_strided_slice %166 {offsets = [0, 32], sizes = [2, 32], strides = [1, 1]} : vector<2x128xf32> to vector<2x32xf32>
    %174 = arith.negf %173 : vector<2x32xf32>
    %175 = math.exp %174 : vector<2x32xf32>
    %cst_90 = arith.constant 1.000000e+00 : f32
    %176 = vector.broadcast %cst_90 : f32 to vector<2x32xf32>
    %177 = arith.addf %176, %175 : vector<2x32xf32>
    %178 = arith.divf %176, %177 : vector<2x32xf32>
    %179 = vector.extract_strided_slice %166 {offsets = [0, 64], sizes = [2, 32], strides = [1, 1]} : vector<2x128xf32> to vector<2x32xf32>
    %180 = math.tanh %179 : vector<2x32xf32>
    %181 = vector.extract_strided_slice %166 {offsets = [0, 96], sizes = [2, 32], strides = [1, 1]} : vector<2x128xf32> to vector<2x32xf32>
    %182 = arith.negf %181 : vector<2x32xf32>
    %183 = math.exp %182 : vector<2x32xf32>
    %cst_91 = arith.constant 1.000000e+00 : f32
    %184 = vector.broadcast %cst_91 : f32 to vector<2x32xf32>
    %185 = arith.addf %184, %183 : vector<2x32xf32>
    %186 = arith.divf %184, %185 : vector<2x32xf32>
    %187 = arith.mulf %178, %156 : vector<2x32xf32>
    %188 = arith.mulf %172, %180 : vector<2x32xf32>
    %189 = arith.addf %187, %188 : vector<2x32xf32>
    %190 = math.tanh %189 : vector<2x32xf32>
    %191 = arith.mulf %186, %190 : vector<2x32xf32>
    %c3_92 = arith.constant 3 : index
    %c0_93 = arith.constant 0 : index
    %c0_94 = arith.constant 0 : index
    %192 = vector.load %arg10[%c3_92, %c0_93, %c0_94] : memref<8x2x32xf32, #tpu.memory_space<vmem>>, vector<1x2x32xf32>
    %193 = vector.shape_cast %192 : vector<1x2x32xf32> to vector<2x32xf32>
    %194 = vector.shape_cast %191 : vector<2x32xf32> to vector<1x2x32xf32>
    tpu.vector_store %arg10[%c3_92, %c0_93, %c0_94], %194 {strides = array<i32>} : memref<8x2x32xf32, #tpu.memory_space<vmem>>, vector<1x2x32xf32>,
    %c4_95 = arith.constant 4 : index
    %c0_96 = arith.constant 0 : index
    %c0_97 = arith.constant 0 : index
    %195 = vector.load %arg11[%c4_95, %c0_96, %c0_97] : memref<8x2x128xf32, #tpu.memory_space<vmem>>, vector<1x2x128xf32>
    %196 = vector.shape_cast %195 : vector<1x2x128xf32> to vector<2x128xf32>
    %197 = arith.truncf %191 : vector<2x32xf32> to vector<2x32xbf16>
    %cst_98 = arith.constant dense<0.000000e+00> : vector<2x128xf32>
    %198 = tpu.matmul %197, %1, %cst_98 {dimension_numbers = #tpu.dot_dimension_numbers<[1], [0], [0], [1], [0, 0, 1, 1], [], []>} : vector<2x32xbf16>, vector<32x128xbf16>, vector<2x128xf32> -> vector<2x128xf32>
    %199 = arith.addf %196, %198 : vector<2x128xf32>
    %200 = vector.extract_strided_slice %199 {offsets = [0, 0], sizes = [2, 32], strides = [1, 1]} : vector<2x128xf32> to vector<2x32xf32>
    %201 = arith.negf %200 : vector<2x32xf32>
    %202 = math.exp %201 : vector<2x32xf32>
    %cst_99 = arith.constant 1.000000e+00 : f32
    %203 = vector.broadcast %cst_99 : f32 to vector<2x32xf32>
    %204 = arith.addf %203, %202 : vector<2x32xf32>
    %205 = arith.divf %203, %204 : vector<2x32xf32>
    %206 = vector.extract_strided_slice %199 {offsets = [0, 32], sizes = [2, 32], strides = [1, 1]} : vector<2x128xf32> to vector<2x32xf32>
    %207 = arith.negf %206 : vector<2x32xf32>
    %208 = math.exp %207 : vector<2x32xf32>
    %cst_100 = arith.constant 1.000000e+00 : f32
    %209 = vector.broadcast %cst_100 : f32 to vector<2x32xf32>
    %210 = arith.addf %209, %208 : vector<2x32xf32>
    %211 = arith.divf %209, %210 : vector<2x32xf32>
    %212 = vector.extract_strided_slice %199 {offsets = [0, 64], sizes = [2, 32], strides = [1, 1]} : vector<2x128xf32> to vector<2x32xf32>
    %213 = math.tanh %212 : vector<2x32xf32>
    %214 = vector.extract_strided_slice %199 {offsets = [0, 96], sizes = [2, 32], strides = [1, 1]} : vector<2x128xf32> to vector<2x32xf32>
    %215 = arith.negf %214 : vector<2x32xf32>
    %216 = math.exp %215 : vector<2x32xf32>
    %cst_101 = arith.constant 1.000000e+00 : f32
    %217 = vector.broadcast %cst_101 : f32 to vector<2x32xf32>
    %218 = arith.addf %217, %216 : vector<2x32xf32>
    %219 = arith.divf %217, %218 : vector<2x32xf32>
    %220 = arith.mulf %211, %189 : vector<2x32xf32>
    %221 = arith.mulf %205, %213 : vector<2x32xf32>
    %222 = arith.addf %220, %221 : vector<2x32xf32>
    %223 = math.tanh %222 : vector<2x32xf32>
    %224 = arith.mulf %219, %223 : vector<2x32xf32>
    %c4_102 = arith.constant 4 : index
    %c0_103 = arith.constant 0 : index
    %c0_104 = arith.constant 0 : index
    %225 = vector.load %arg10[%c4_102, %c0_103, %c0_104] : memref<8x2x32xf32, #tpu.memory_space<vmem>>, vector<1x2x32xf32>
    %226 = vector.shape_cast %225 : vector<1x2x32xf32> to vector<2x32xf32>
    %227 = vector.shape_cast %224 : vector<2x32xf32> to vector<1x2x32xf32>
    tpu.vector_store %arg10[%c4_102, %c0_103, %c0_104], %227 {strides = array<i32>} : memref<8x2x32xf32, #tpu.memory_space<vmem>>, vector<1x2x32xf32>,
    %c5_105 = arith.constant 5 : index
    %c0_106 = arith.constant 0 : index
    %c0_107 = arith.constant 0 : index
    %228 = vector.load %arg11[%c5_105, %c0_106, %c0_107] : memref<8x2x128xf32, #tpu.memory_space<vmem>>, vector<1x2x128xf32>
    %229 = vector.shape_cast %228 : vector<1x2x128xf32> to vector<2x128xf32>
    %230 = arith.truncf %224 : vector<2x32xf32> to vector<2x32xbf16>
    %cst_108 = arith.constant dense<0.000000e+00> : vector<2x128xf32>
    %231 = tpu.matmul %230, %1, %cst_108 {dimension_numbers = #tpu.dot_dimension_numbers<[1], [0], [0], [1], [0, 0, 1, 1], [], []>} : vector<2x32xbf16>, vector<32x128xbf16>, vector<2x128xf32> -> vector<2x128xf32>
    %232 = arith.addf %229, %231 : vector<2x128xf32>
    %233 = vector.extract_strided_slice %232 {offsets = [0, 0], sizes = [2, 32], strides = [1, 1]} : vector<2x128xf32> to vector<2x32xf32>
    %234 = arith.negf %233 : vector<2x32xf32>
    %235 = math.exp %234 : vector<2x32xf32>
    %cst_109 = arith.constant 1.000000e+00 : f32
    %236 = vector.broadcast %cst_109 : f32 to vector<2x32xf32>
    %237 = arith.addf %236, %235 : vector<2x32xf32>
    %238 = arith.divf %236, %237 : vector<2x32xf32>
    %239 = vector.extract_strided_slice %232 {offsets = [0, 32], sizes = [2, 32], strides = [1, 1]} : vector<2x128xf32> to vector<2x32xf32>
    %240 = arith.negf %239 : vector<2x32xf32>
    %241 = math.exp %240 : vector<2x32xf32>
    %cst_110 = arith.constant 1.000000e+00 : f32
    %242 = vector.broadcast %cst_110 : f32 to vector<2x32xf32>
    %243 = arith.addf %242, %241 : vector<2x32xf32>
    %244 = arith.divf %242, %243 : vector<2x32xf32>
    %245 = vector.extract_strided_slice %232 {offsets = [0, 64], sizes = [2, 32], strides = [1, 1]} : vector<2x128xf32> to vector<2x32xf32>
    %246 = math.tanh %245 : vector<2x32xf32>
    %247 = vector.extract_strided_slice %232 {offsets = [0, 96], sizes = [2, 32], strides = [1, 1]} : vector<2x128xf32> to vector<2x32xf32>
    %248 = arith.negf %247 : vector<2x32xf32>
    %249 = math.exp %248 : vector<2x32xf32>
    %cst_111 = arith.constant 1.000000e+00 : f32
    %250 = vector.broadcast %cst_111 : f32 to vector<2x32xf32>
    %251 = arith.addf %250, %249 : vector<2x32xf32>
    %252 = arith.divf %250, %251 : vector<2x32xf32>
    %253 = arith.mulf %244, %222 : vector<2x32xf32>
    %254 = arith.mulf %238, %246 : vector<2x32xf32>
    %255 = arith.addf %253, %254 : vector<2x32xf32>
    %256 = math.tanh %255 : vector<2x32xf32>
    %257 = arith.mulf %252, %256 : vector<2x32xf32>
    %c5_112 = arith.constant 5 : index
    %c0_113 = arith.constant 0 : index
    %c0_114 = arith.constant 0 : index
    %258 = vector.load %arg10[%c5_112, %c0_113, %c0_114] : memref<8x2x32xf32, #tpu.memory_space<vmem>>, vector<1x2x32xf32>
    %259 = vector.shape_cast %258 : vector<1x2x32xf32> to vector<2x32xf32>
    %260 = vector.shape_cast %257 : vector<2x32xf32> to vector<1x2x32xf32>
    tpu.vector_store %arg10[%c5_112, %c0_113, %c0_114], %260 {strides = array<i32>} : memref<8x2x32xf32, #tpu.memory_space<vmem>>, vector<1x2x32xf32>,
    %c6_115 = arith.constant 6 : index
    %c0_116 = arith.constant 0 : index
    %c0_117 = arith.constant 0 : index
    %261 = vector.load %arg11[%c6_115, %c0_116, %c0_117] : memref<8x2x128xf32, #tpu.memory_space<vmem>>, vector<1x2x128xf32>
    %262 = vector.shape_cast %261 : vector<1x2x128xf32> to vector<2x128xf32>
    %263 = arith.truncf %257 : vector<2x32xf32> to vector<2x32xbf16>
    %cst_118 = arith.constant dense<0.000000e+00> : vector<2x128xf32>
    %264 = tpu.matmul %263, %1, %cst_118 {dimension_numbers = #tpu.dot_dimension_numbers<[1], [0], [0], [1], [0, 0, 1, 1], [], []>} : vector<2x32xbf16>, vector<32x128xbf16>, vector<2x128xf32> -> vector<2x128xf32>
    %265 = arith.addf %262, %264 : vector<2x128xf32>
    %266 = vector.extract_strided_slice %265 {offsets = [0, 0], sizes = [2, 32], strides = [1, 1]} : vector<2x128xf32> to vector<2x32xf32>
    %267 = arith.negf %266 : vector<2x32xf32>
    %268 = math.exp %267 : vector<2x32xf32>
    %cst_119 = arith.constant 1.000000e+00 : f32
    %269 = vector.broadcast %cst_119 : f32 to vector<2x32xf32>
    %270 = arith.addf %269, %268 : vector<2x32xf32>
    %271 = arith.divf %269, %270 : vector<2x32xf32>
    %272 = vector.extract_strided_slice %265 {offsets = [0, 32], sizes = [2, 32], strides = [1, 1]} : vector<2x128xf32> to vector<2x32xf32>
    %273 = arith.negf %272 : vector<2x32xf32>
    %274 = math.exp %273 : vector<2x32xf32>
    %cst_120 = arith.constant 1.000000e+00 : f32
    %275 = vector.broadcast %cst_120 : f32 to vector<2x32xf32>
    %276 = arith.addf %275, %274 : vector<2x32xf32>
    %277 = arith.divf %275, %276 : vector<2x32xf32>
    %278 = vector.extract_strided_slice %265 {offsets = [0, 64], sizes = [2, 32], strides = [1, 1]} : vector<2x128xf32> to vector<2x32xf32>
    %279 = math.tanh %278 : vector<2x32xf32>
    %280 = vector.extract_strided_slice %265 {offsets = [0, 96], sizes = [2, 32], strides = [1, 1]} : vector<2x128xf32> to vector<2x32xf32>
    %281 = arith.negf %280 : vector<2x32xf32>
    %282 = math.exp %281 : vector<2x32xf32>
    %cst_121 = arith.constant 1.000000e+00 : f32
    %283 = vector.broadcast %cst_121 : f32 to vector<2x32xf32>
    %284 = arith.addf %283, %282 : vector<2x32xf32>
    %285 = arith.divf %283, %284 : vector<2x32xf32>
    %286 = arith.mulf %277, %255 : vector<2x32xf32>
    %287 = arith.mulf %271, %279 : vector<2x32xf32>
    %288 = arith.addf %286, %287 : vector<2x32xf32>
    %289 = math.tanh %288 : vector<2x32xf32>
    %290 = arith.mulf %285, %289 : vector<2x32xf32>
    %c6_122 = arith.constant 6 : index
    %c0_123 = arith.constant 0 : index
    %c0_124 = arith.constant 0 : index
    %291 = vector.load %arg10[%c6_122, %c0_123, %c0_124] : memref<8x2x32xf32, #tpu.memory_space<vmem>>, vector<1x2x32xf32>
    %292 = vector.shape_cast %291 : vector<1x2x32xf32> to vector<2x32xf32>
    %293 = vector.shape_cast %290 : vector<2x32xf32> to vector<1x2x32xf32>
    tpu.vector_store %arg10[%c6_122, %c0_123, %c0_124], %293 {strides = array<i32>} : memref<8x2x32xf32, #tpu.memory_space<vmem>>, vector<1x2x32xf32>,
    %c7_125 = arith.constant 7 : index
    %c0_126 = arith.constant 0 : index
    %c0_127 = arith.constant 0 : index
    %294 = vector.load %arg11[%c7_125, %c0_126, %c0_127] : memref<8x2x128xf32, #tpu.memory_space<vmem>>, vector<1x2x128xf32>
    %295 = vector.shape_cast %294 : vector<1x2x128xf32> to vector<2x128xf32>
    %296 = arith.truncf %290 : vector<2x32xf32> to vector<2x32xbf16>
    %cst_128 = arith.constant dense<0.000000e+00> : vector<2x128xf32>
    %297 = tpu.matmul %296, %1, %cst_128 {dimension_numbers = #tpu.dot_dimension_numbers<[1], [0], [0], [1], [0, 0, 1, 1], [], []>} : vector<2x32xbf16>, vector<32x128xbf16>, vector<2x128xf32> -> vector<2x128xf32>
    %298 = arith.addf %295, %297 : vector<2x128xf32>
    %299 = vector.extract_strided_slice %298 {offsets = [0, 0], sizes = [2, 32], strides = [1, 1]} : vector<2x128xf32> to vector<2x32xf32>
    %300 = arith.negf %299 : vector<2x32xf32>
    %301 = math.exp %300 : vector<2x32xf32>
    %cst_129 = arith.constant 1.000000e+00 : f32
    %302 = vector.broadcast %cst_129 : f32 to vector<2x32xf32>
    %303 = arith.addf %302, %301 : vector<2x32xf32>
    %304 = arith.divf %302, %303 : vector<2x32xf32>
    %305 = vector.extract_strided_slice %298 {offsets = [0, 32], sizes = [2, 32], strides = [1, 1]} : vector<2x128xf32> to vector<2x32xf32>
    %306 = arith.negf %305 : vector<2x32xf32>
    %307 = math.exp %306 : vector<2x32xf32>
    %cst_130 = arith.constant 1.000000e+00 : f32
    %308 = vector.broadcast %cst_130 : f32 to vector<2x32xf32>
    %309 = arith.addf %308, %307 : vector<2x32xf32>
    %310 = arith.divf %308, %309 : vector<2x32xf32>
    %311 = vector.extract_strided_slice %298 {offsets = [0, 64], sizes = [2, 32], strides = [1, 1]} : vector<2x128xf32> to vector<2x32xf32>
    %312 = math.tanh %311 : vector<2x32xf32>
    %313 = vector.extract_strided_slice %298 {offsets = [0, 96], sizes = [2, 32], strides = [1, 1]} : vector<2x128xf32> to vector<2x32xf32>
    %314 = arith.negf %313 : vector<2x32xf32>
    %315 = math.exp %314 : vector<2x32xf32>
    %cst_131 = arith.constant 1.000000e+00 : f32
    %316 = vector.broadcast %cst_131 : f32 to vector<2x32xf32>
    %317 = arith.addf %316, %315 : vector<2x32xf32>
    %318 = arith.divf %316, %317 : vector<2x32xf32>
    %319 = arith.mulf %310, %288 : vector<2x32xf32>
    %320 = arith.mulf %304, %312 : vector<2x32xf32>
    %321 = arith.addf %319, %320 : vector<2x32xf32>
    %322 = math.tanh %321 : vector<2x32xf32>
    %323 = arith.mulf %318, %322 : vector<2x32xf32>
    %c7_132 = arith.constant 7 : index
    %c0_133 = arith.constant 0 : index
    %c0_134 = arith.constant 0 : index
    %324 = vector.load %arg10[%c7_132, %c0_133, %c0_134] : memref<8x2x32xf32, #tpu.memory_space<vmem>>, vector<1x2x32xf32>
    %325 = vector.shape_cast %324 : vector<1x2x32xf32> to vector<2x32xf32>
    %326 = vector.shape_cast %323 : vector<2x32xf32> to vector<1x2x32xf32>
    tpu.vector_store %arg10[%c7_132, %c0_133, %c0_134], %326 {strides = array<i32>} : memref<8x2x32xf32, #tpu.memory_space<vmem>>, vector<1x2x32xf32>,
    %c0_135 = arith.constant 0 : index
    %c0_136 = arith.constant 0 : index
    %327 = vector.load %arg4[%c0_135, %c0_136] : memref<32x128xbf16, #tpu.memory_space<vmem>>, vector<32x128xbf16>
    %c0_137 = arith.constant 0 : index
    %c0_138 = arith.constant 0 : index
    %328 = vector.load %arg5[%c0_137, %c0_138] : memref<32x128xbf16, #tpu.memory_space<vmem>>, vector<32x128xbf16>
    %c0_139 = arith.constant 0 : index
    %c0_140 = arith.constant 0 : index
    %329 = vector.load %arg6[%c0_139, %c0_140] : memref<1x128xf32, #tpu.memory_space<vmem>>, vector<1x128xf32>
    %330 = vector.shape_cast %329 : vector<1x128xf32> to vector<1x128xf32>
    %331 = vector.broadcast %330 : vector<1x128xf32> to vector<2x128xf32>
    %c0_141 = arith.constant 0 : index
    %c0_142 = arith.constant 0 : index
    %c0_143 = arith.constant 0 : index
    %332 = vector.load %arg10[%c0_141, %c0_142, %c0_143] : memref<8x2x32xf32, #tpu.memory_space<vmem>>, vector<1x2x32xf32>
    %333 = vector.shape_cast %332 : vector<1x2x32xf32> to vector<2x32xf32>
    %334 = arith.truncf %333 : vector<2x32xf32> to vector<2x32xbf16>
    %cst_144 = arith.constant dense<0.000000e+00> : vector<2x128xf32>
    %335 = tpu.matmul %334, %327, %cst_144 {dimension_numbers = #tpu.dot_dimension_numbers<[1], [0], [0], [1], [0, 0, 1, 1], [], []>} : vector<2x32xbf16>, vector<32x128xbf16>, vector<2x128xf32> -> vector<2x128xf32>
    %336 = arith.addf %335, %331 : vector<2x128xf32>
    %c0_145 = arith.constant 0 : index
    %c0_146 = arith.constant 0 : index
    %c0_147 = arith.constant 0 : index
    %337 = vector.load %arg11[%c0_145, %c0_146, %c0_147] : memref<8x2x128xf32, #tpu.memory_space<vmem>>, vector<1x2x128xf32>
    %338 = vector.shape_cast %337 : vector<1x2x128xf32> to vector<2x128xf32>
    %339 = vector.shape_cast %336 : vector<2x128xf32> to vector<1x2x128xf32>
    tpu.vector_store %arg11[%c0_145, %c0_146, %c0_147], %339 {strides = array<i32>} : memref<8x2x128xf32, #tpu.memory_space<vmem>>, vector<1x2x128xf32>,
    %c1_148 = arith.constant 1 : index
    %c0_149 = arith.constant 0 : index
    %c0_150 = arith.constant 0 : index
    %340 = vector.load %arg10[%c1_148, %c0_149, %c0_150] : memref<8x2x32xf32, #tpu.memory_space<vmem>>, vector<1x2x32xf32>
    %341 = vector.shape_cast %340 : vector<1x2x32xf32> to vector<2x32xf32>
    %342 = arith.truncf %341 : vector<2x32xf32> to vector<2x32xbf16>
    %cst_151 = arith.constant dense<0.000000e+00> : vector<2x128xf32>
    %343 = tpu.matmul %342, %327, %cst_151 {dimension_numbers = #tpu.dot_dimension_numbers<[1], [0], [0], [1], [0, 0, 1, 1], [], []>} : vector<2x32xbf16>, vector<32x128xbf16>, vector<2x128xf32> -> vector<2x128xf32>
    %344 = arith.addf %343, %331 : vector<2x128xf32>
    %c1_152 = arith.constant 1 : index
    %c0_153 = arith.constant 0 : index
    %c0_154 = arith.constant 0 : index
    %345 = vector.load %arg11[%c1_152, %c0_153, %c0_154] : memref<8x2x128xf32, #tpu.memory_space<vmem>>, vector<1x2x128xf32>
    %346 = vector.shape_cast %345 : vector<1x2x128xf32> to vector<2x128xf32>
    %347 = vector.shape_cast %344 : vector<2x128xf32> to vector<1x2x128xf32>
    tpu.vector_store %arg11[%c1_152, %c0_153, %c0_154], %347 {strides = array<i32>} : memref<8x2x128xf32, #tpu.memory_space<vmem>>, vector<1x2x128xf32>,
    %c2_155 = arith.constant 2 : index
    %c0_156 = arith.constant 0 : index
    %c0_157 = arith.constant 0 : index
    %348 = vector.load %arg10[%c2_155, %c0_156, %c0_157] : memref<8x2x32xf32, #tpu.memory_space<vmem>>, vector<1x2x32xf32>
    %349 = vector.shape_cast %348 : vector<1x2x32xf32> to vector<2x32xf32>
    %350 = arith.truncf %349 : vector<2x32xf32> to vector<2x32xbf16>
    %cst_158 = arith.constant dense<0.000000e+00> : vector<2x128xf32>
    %351 = tpu.matmul %350, %327, %cst_158 {dimension_numbers = #tpu.dot_dimension_numbers<[1], [0], [0], [1], [0, 0, 1, 1], [], []>} : vector<2x32xbf16>, vector<32x128xbf16>, vector<2x128xf32> -> vector<2x128xf32>
    %352 = arith.addf %351, %331 : vector<2x128xf32>
    %c2_159 = arith.constant 2 : index
    %c0_160 = arith.constant 0 : index
    %c0_161 = arith.constant 0 : index
    %353 = vector.load %arg11[%c2_159, %c0_160, %c0_161] : memref<8x2x128xf32, #tpu.memory_space<vmem>>, vector<1x2x128xf32>
    %354 = vector.shape_cast %353 : vector<1x2x128xf32> to vector<2x128xf32>
    %355 = vector.shape_cast %352 : vector<2x128xf32> to vector<1x2x128xf32>
    tpu.vector_store %arg11[%c2_159, %c0_160, %c0_161], %355 {strides = array<i32>} : memref<8x2x128xf32, #tpu.memory_space<vmem>>, vector<1x2x128xf32>,
    %c3_162 = arith.constant 3 : index
    %c0_163 = arith.constant 0 : index
    %c0_164 = arith.constant 0 : index
    %356 = vector.load %arg10[%c3_162, %c0_163, %c0_164] : memref<8x2x32xf32, #tpu.memory_space<vmem>>, vector<1x2x32xf32>
    %357 = vector.shape_cast %356 : vector<1x2x32xf32> to vector<2x32xf32>
    %358 = arith.truncf %357 : vector<2x32xf32> to vector<2x32xbf16>
    %cst_165 = arith.constant dense<0.000000e+00> : vector<2x128xf32>
    %359 = tpu.matmul %358, %327, %cst_165 {dimension_numbers = #tpu.dot_dimension_numbers<[1], [0], [0], [1], [0, 0, 1, 1], [], []>} : vector<2x32xbf16>, vector<32x128xbf16>, vector<2x128xf32> -> vector<2x128xf32>
    %360 = arith.addf %359, %331 : vector<2x128xf32>
    %c3_166 = arith.constant 3 : index
    %c0_167 = arith.constant 0 : index
    %c0_168 = arith.constant 0 : index
    %361 = vector.load %arg11[%c3_166, %c0_167, %c0_168] : memref<8x2x128xf32, #tpu.memory_space<vmem>>, vector<1x2x128xf32>
    %362 = vector.shape_cast %361 : vector<1x2x128xf32> to vector<2x128xf32>
    %363 = vector.shape_cast %360 : vector<2x128xf32> to vector<1x2x128xf32>
    tpu.vector_store %arg11[%c3_166, %c0_167, %c0_168], %363 {strides = array<i32>} : memref<8x2x128xf32, #tpu.memory_space<vmem>>, vector<1x2x128xf32>,
    %c4_169 = arith.constant 4 : index
    %c0_170 = arith.constant 0 : index
    %c0_171 = arith.constant 0 : index
    %364 = vector.load %arg10[%c4_169, %c0_170, %c0_171] : memref<8x2x32xf32, #tpu.memory_space<vmem>>, vector<1x2x32xf32>
    %365 = vector.shape_cast %364 : vector<1x2x32xf32> to vector<2x32xf32>
    %366 = arith.truncf %365 : vector<2x32xf32> to vector<2x32xbf16>
    %cst_172 = arith.constant dense<0.000000e+00> : vector<2x128xf32>
    %367 = tpu.matmul %366, %327, %cst_172 {dimension_numbers = #tpu.dot_dimension_numbers<[1], [0], [0], [1], [0, 0, 1, 1], [], []>} : vector<2x32xbf16>, vector<32x128xbf16>, vector<2x128xf32> -> vector<2x128xf32>
    %368 = arith.addf %367, %331 : vector<2x128xf32>
    %c4_173 = arith.constant 4 : index
    %c0_174 = arith.constant 0 : index
    %c0_175 = arith.constant 0 : index
    %369 = vector.load %arg11[%c4_173, %c0_174, %c0_175] : memref<8x2x128xf32, #tpu.memory_space<vmem>>, vector<1x2x128xf32>
    %370 = vector.shape_cast %369 : vector<1x2x128xf32> to vector<2x128xf32>
    %371 = vector.shape_cast %368 : vector<2x128xf32> to vector<1x2x128xf32>
    tpu.vector_store %arg11[%c4_173, %c0_174, %c0_175], %371 {strides = array<i32>} : memref<8x2x128xf32, #tpu.memory_space<vmem>>, vector<1x2x128xf32>,
    %c5_176 = arith.constant 5 : index
    %c0_177 = arith.constant 0 : index
    %c0_178 = arith.constant 0 : index
    %372 = vector.load %arg10[%c5_176, %c0_177, %c0_178] : memref<8x2x32xf32, #tpu.memory_space<vmem>>, vector<1x2x32xf32>
    %373 = vector.shape_cast %372 : vector<1x2x32xf32> to vector<2x32xf32>
    %374 = arith.truncf %373 : vector<2x32xf32> to vector<2x32xbf16>
    %cst_179 = arith.constant dense<0.000000e+00> : vector<2x128xf32>
    %375 = tpu.matmul %374, %327, %cst_179 {dimension_numbers = #tpu.dot_dimension_numbers<[1], [0], [0], [1], [0, 0, 1, 1], [], []>} : vector<2x32xbf16>, vector<32x128xbf16>, vector<2x128xf32> -> vector<2x128xf32>
    %376 = arith.addf %375, %331 : vector<2x128xf32>
    %c5_180 = arith.constant 5 : index
    %c0_181 = arith.constant 0 : index
    %c0_182 = arith.constant 0 : index
    %377 = vector.load %arg11[%c5_180, %c0_181, %c0_182] : memref<8x2x128xf32, #tpu.memory_space<vmem>>, vector<1x2x128xf32>
    %378 = vector.shape_cast %377 : vector<1x2x128xf32> to vector<2x128xf32>
    %379 = vector.shape_cast %376 : vector<2x128xf32> to vector<1x2x128xf32>
    tpu.vector_store %arg11[%c5_180, %c0_181, %c0_182], %379 {strides = array<i32>} : memref<8x2x128xf32, #tpu.memory_space<vmem>>, vector<1x2x128xf32>,
    %c6_183 = arith.constant 6 : index
    %c0_184 = arith.constant 0 : index
    %c0_185 = arith.constant 0 : index
    %380 = vector.load %arg10[%c6_183, %c0_184, %c0_185] : memref<8x2x32xf32, #tpu.memory_space<vmem>>, vector<1x2x32xf32>
    %381 = vector.shape_cast %380 : vector<1x2x32xf32> to vector<2x32xf32>
    %382 = arith.truncf %381 : vector<2x32xf32> to vector<2x32xbf16>
    %cst_186 = arith.constant dense<0.000000e+00> : vector<2x128xf32>
    %383 = tpu.matmul %382, %327, %cst_186 {dimension_numbers = #tpu.dot_dimension_numbers<[1], [0], [0], [1], [0, 0, 1, 1], [], []>} : vector<2x32xbf16>, vector<32x128xbf16>, vector<2x128xf32> -> vector<2x128xf32>
    %384 = arith.addf %383, %331 : vector<2x128xf32>
    %c6_187 = arith.constant 6 : index
    %c0_188 = arith.constant 0 : index
    %c0_189 = arith.constant 0 : index
    %385 = vector.load %arg11[%c6_187, %c0_188, %c0_189] : memref<8x2x128xf32, #tpu.memory_space<vmem>>, vector<1x2x128xf32>
    %386 = vector.shape_cast %385 : vector<1x2x128xf32> to vector<2x128xf32>
    %387 = vector.shape_cast %384 : vector<2x128xf32> to vector<1x2x128xf32>
    tpu.vector_store %arg11[%c6_187, %c0_188, %c0_189], %387 {strides = array<i32>} : memref<8x2x128xf32, #tpu.memory_space<vmem>>, vector<1x2x128xf32>,
    %c7_190 = arith.constant 7 : index
    %c0_191 = arith.constant 0 : index
    %c0_192 = arith.constant 0 : index
    %388 = vector.load %arg10[%c7_190, %c0_191, %c0_192] : memref<8x2x32xf32, #tpu.memory_space<vmem>>, vector<1x2x32xf32>
    %389 = vector.shape_cast %388 : vector<1x2x32xf32> to vector<2x32xf32>
    %390 = arith.truncf %389 : vector<2x32xf32> to vector<2x32xbf16>
    %cst_193 = arith.constant dense<0.000000e+00> : vector<2x128xf32>
    %391 = tpu.matmul %390, %327, %cst_193 {dimension_numbers = #tpu.dot_dimension_numbers<[1], [0], [0], [1], [0, 0, 1, 1], [], []>} : vector<2x32xbf16>, vector<32x128xbf16>, vector<2x128xf32> -> vector<2x128xf32>
    %392 = arith.addf %391, %331 : vector<2x128xf32>
    %c7_194 = arith.constant 7 : index
    %c0_195 = arith.constant 0 : index
    %c0_196 = arith.constant 0 : index
    %393 = vector.load %arg11[%c7_194, %c0_195, %c0_196] : memref<8x2x128xf32, #tpu.memory_space<vmem>>, vector<1x2x128xf32>
    %394 = vector.shape_cast %393 : vector<1x2x128xf32> to vector<2x128xf32>
    %395 = vector.shape_cast %392 : vector<2x128xf32> to vector<1x2x128xf32>
    tpu.vector_store %arg11[%c7_194, %c0_195, %c0_196], %395 {strides = array<i32>} : memref<8x2x128xf32, #tpu.memory_space<vmem>>, vector<1x2x128xf32>,
    %cst_197 = arith.constant 0.000000e+00 : f32
    %396 = vector.broadcast %cst_197 : f32 to vector<2x32xf32>
    %cst_198 = arith.constant 0.000000e+00 : f32
    %397 = vector.broadcast %cst_198 : f32 to vector<2x32xf32>
    %c0_199 = arith.constant 0 : index
    %c0_200 = arith.constant 0 : index
    %c0_201 = arith.constant 0 : index
    %398 = vector.load %arg11[%c0_199, %c0_200, %c0_201] : memref<8x2x128xf32, #tpu.memory_space<vmem>>, vector<1x2x128xf32>
    %399 = vector.shape_cast %398 : vector<1x2x128xf32> to vector<2x128xf32>
    %400 = arith.truncf %396 : vector<2x32xf32> to vector<2x32xbf16>
    %cst_202 = arith.constant dense<0.000000e+00> : vector<2x128xf32>
    %401 = tpu.matmul %400, %328, %cst_202 {dimension_numbers = #tpu.dot_dimension_numbers<[1], [0], [0], [1], [0, 0, 1, 1], [], []>} : vector<2x32xbf16>, vector<32x128xbf16>, vector<2x128xf32> -> vector<2x128xf32>
    %402 = arith.addf %399, %401 : vector<2x128xf32>
    %403 = vector.extract_strided_slice %402 {offsets = [0, 0], sizes = [2, 32], strides = [1, 1]} : vector<2x128xf32> to vector<2x32xf32>
    %404 = arith.negf %403 : vector<2x32xf32>
    %405 = math.exp %404 : vector<2x32xf32>
    %cst_203 = arith.constant 1.000000e+00 : f32
    %406 = vector.broadcast %cst_203 : f32 to vector<2x32xf32>
    %407 = arith.addf %406, %405 : vector<2x32xf32>
    %408 = arith.divf %406, %407 : vector<2x32xf32>
    %409 = vector.extract_strided_slice %402 {offsets = [0, 32], sizes = [2, 32], strides = [1, 1]} : vector<2x128xf32> to vector<2x32xf32>
    %410 = arith.negf %409 : vector<2x32xf32>
    %411 = math.exp %410 : vector<2x32xf32>
    %cst_204 = arith.constant 1.000000e+00 : f32
    %412 = vector.broadcast %cst_204 : f32 to vector<2x32xf32>
    %413 = arith.addf %412, %411 : vector<2x32xf32>
    %414 = arith.divf %412, %413 : vector<2x32xf32>
    %415 = vector.extract_strided_slice %402 {offsets = [0, 64], sizes = [2, 32], strides = [1, 1]} : vector<2x128xf32> to vector<2x32xf32>
    %416 = math.tanh %415 : vector<2x32xf32>
    %417 = vector.extract_strided_slice %402 {offsets = [0, 96], sizes = [2, 32], strides = [1, 1]} : vector<2x128xf32> to vector<2x32xf32>
    %418 = arith.negf %417 : vector<2x32xf32>
    %419 = math.exp %418 : vector<2x32xf32>
    %cst_205 = arith.constant 1.000000e+00 : f32
    %420 = vector.broadcast %cst_205 : f32 to vector<2x32xf32>
    %421 = arith.addf %420, %419 : vector<2x32xf32>
    %422 = arith.divf %420, %421 : vector<2x32xf32>
    %423 = arith.mulf %414, %397 : vector<2x32xf32>
    %424 = arith.mulf %408, %416 : vector<2x32xf32>
    %425 = arith.addf %423, %424 : vector<2x32xf32>
    %426 = math.tanh %425 : vector<2x32xf32>
    %427 = arith.mulf %422, %426 : vector<2x32xf32>
    %c1_206 = arith.constant 1 : index
    %c0_207 = arith.constant 0 : index
    %c0_208 = arith.constant 0 : index
    %428 = vector.load %arg11[%c1_206, %c0_207, %c0_208] : memref<8x2x128xf32, #tpu.memory_space<vmem>>, vector<1x2x128xf32>
    %429 = vector.shape_cast %428 : vector<1x2x128xf32> to vector<2x128xf32>
    %430 = arith.truncf %427 : vector<2x32xf32> to vector<2x32xbf16>
    %cst_209 = arith.constant dense<0.000000e+00> : vector<2x128xf32>
    %431 = tpu.matmul %430, %328, %cst_209 {dimension_numbers = #tpu.dot_dimension_numbers<[1], [0], [0], [1], [0, 0, 1, 1], [], []>} : vector<2x32xbf16>, vector<32x128xbf16>, vector<2x128xf32> -> vector<2x128xf32>
    %432 = arith.addf %429, %431 : vector<2x128xf32>
    %433 = vector.extract_strided_slice %432 {offsets = [0, 0], sizes = [2, 32], strides = [1, 1]} : vector<2x128xf32> to vector<2x32xf32>
    %434 = arith.negf %433 : vector<2x32xf32>
    %435 = math.exp %434 : vector<2x32xf32>
    %cst_210 = arith.constant 1.000000e+00 : f32
    %436 = vector.broadcast %cst_210 : f32 to vector<2x32xf32>
    %437 = arith.addf %436, %435 : vector<2x32xf32>
    %438 = arith.divf %436, %437 : vector<2x32xf32>
    %439 = vector.extract_strided_slice %432 {offsets = [0, 32], sizes = [2, 32], strides = [1, 1]} : vector<2x128xf32> to vector<2x32xf32>
    %440 = arith.negf %439 : vector<2x32xf32>
    %441 = math.exp %440 : vector<2x32xf32>
    %cst_211 = arith.constant 1.000000e+00 : f32
    %442 = vector.broadcast %cst_211 : f32 to vector<2x32xf32>
    %443 = arith.addf %442, %441 : vector<2x32xf32>
    %444 = arith.divf %442, %443 : vector<2x32xf32>
    %445 = vector.extract_strided_slice %432 {offsets = [0, 64], sizes = [2, 32], strides = [1, 1]} : vector<2x128xf32> to vector<2x32xf32>
    %446 = math.tanh %445 : vector<2x32xf32>
    %447 = vector.extract_strided_slice %432 {offsets = [0, 96], sizes = [2, 32], strides = [1, 1]} : vector<2x128xf32> to vector<2x32xf32>
    %448 = arith.negf %447 : vector<2x32xf32>
    %449 = math.exp %448 : vector<2x32xf32>
    %cst_212 = arith.constant 1.000000e+00 : f32
    %450 = vector.broadcast %cst_212 : f32 to vector<2x32xf32>
    %451 = arith.addf %450, %449 : vector<2x32xf32>
    %452 = arith.divf %450, %451 : vector<2x32xf32>
    %453 = arith.mulf %444, %425 : vector<2x32xf32>
    %454 = arith.mulf %438, %446 : vector<2x32xf32>
    %455 = arith.addf %453, %454 : vector<2x32xf32>
    %456 = math.tanh %455 : vector<2x32xf32>
    %457 = arith.mulf %452, %456 : vector<2x32xf32>
    %c2_213 = arith.constant 2 : index
    %c0_214 = arith.constant 0 : index
    %c0_215 = arith.constant 0 : index
    %458 = vector.load %arg11[%c2_213, %c0_214, %c0_215] : memref<8x2x128xf32, #tpu.memory_space<vmem>>, vector<1x2x128xf32>
    %459 = vector.shape_cast %458 : vector<1x2x128xf32> to vector<2x128xf32>
    %460 = arith.truncf %457 : vector<2x32xf32> to vector<2x32xbf16>
    %cst_216 = arith.constant dense<0.000000e+00> : vector<2x128xf32>
    %461 = tpu.matmul %460, %328, %cst_216 {dimension_numbers = #tpu.dot_dimension_numbers<[1], [0], [0], [1], [0, 0, 1, 1], [], []>} : vector<2x32xbf16>, vector<32x128xbf16>, vector<2x128xf32> -> vector<2x128xf32>
    %462 = arith.addf %459, %461 : vector<2x128xf32>
    %463 = vector.extract_strided_slice %462 {offsets = [0, 0], sizes = [2, 32], strides = [1, 1]} : vector<2x128xf32> to vector<2x32xf32>
    %464 = arith.negf %463 : vector<2x32xf32>
    %465 = math.exp %464 : vector<2x32xf32>
    %cst_217 = arith.constant 1.000000e+00 : f32
    %466 = vector.broadcast %cst_217 : f32 to vector<2x32xf32>
    %467 = arith.addf %466, %465 : vector<2x32xf32>
    %468 = arith.divf %466, %467 : vector<2x32xf32>
    %469 = vector.extract_strided_slice %462 {offsets = [0, 32], sizes = [2, 32], strides = [1, 1]} : vector<2x128xf32> to vector<2x32xf32>
    %470 = arith.negf %469 : vector<2x32xf32>
    %471 = math.exp %470 : vector<2x32xf32>
    %cst_218 = arith.constant 1.000000e+00 : f32
    %472 = vector.broadcast %cst_218 : f32 to vector<2x32xf32>
    %473 = arith.addf %472, %471 : vector<2x32xf32>
    %474 = arith.divf %472, %473 : vector<2x32xf32>
    %475 = vector.extract_strided_slice %462 {offsets = [0, 64], sizes = [2, 32], strides = [1, 1]} : vector<2x128xf32> to vector<2x32xf32>
    %476 = math.tanh %475 : vector<2x32xf32>
    %477 = vector.extract_strided_slice %462 {offsets = [0, 96], sizes = [2, 32], strides = [1, 1]} : vector<2x128xf32> to vector<2x32xf32>
    %478 = arith.negf %477 : vector<2x32xf32>
    %479 = math.exp %478 : vector<2x32xf32>
    %cst_219 = arith.constant 1.000000e+00 : f32
    %480 = vector.broadcast %cst_219 : f32 to vector<2x32xf32>
    %481 = arith.addf %480, %479 : vector<2x32xf32>
    %482 = arith.divf %480, %481 : vector<2x32xf32>
    %483 = arith.mulf %474, %455 : vector<2x32xf32>
    %484 = arith.mulf %468, %476 : vector<2x32xf32>
    %485 = arith.addf %483, %484 : vector<2x32xf32>
    %486 = math.tanh %485 : vector<2x32xf32>
    %487 = arith.mulf %482, %486 : vector<2x32xf32>
    %c3_220 = arith.constant 3 : index
    %c0_221 = arith.constant 0 : index
    %c0_222 = arith.constant 0 : index
    %488 = vector.load %arg11[%c3_220, %c0_221, %c0_222] : memref<8x2x128xf32, #tpu.memory_space<vmem>>, vector<1x2x128xf32>
    %489 = vector.shape_cast %488 : vector<1x2x128xf32> to vector<2x128xf32>
    %490 = arith.truncf %487 : vector<2x32xf32> to vector<2x32xbf16>
    %cst_223 = arith.constant dense<0.000000e+00> : vector<2x128xf32>
    %491 = tpu.matmul %490, %328, %cst_223 {dimension_numbers = #tpu.dot_dimension_numbers<[1], [0], [0], [1], [0, 0, 1, 1], [], []>} : vector<2x32xbf16>, vector<32x128xbf16>, vector<2x128xf32> -> vector<2x128xf32>
    %492 = arith.addf %489, %491 : vector<2x128xf32>
    %493 = vector.extract_strided_slice %492 {offsets = [0, 0], sizes = [2, 32], strides = [1, 1]} : vector<2x128xf32> to vector<2x32xf32>
    %494 = arith.negf %493 : vector<2x32xf32>
    %495 = math.exp %494 : vector<2x32xf32>
    %cst_224 = arith.constant 1.000000e+00 : f32
    %496 = vector.broadcast %cst_224 : f32 to vector<2x32xf32>
    %497 = arith.addf %496, %495 : vector<2x32xf32>
    %498 = arith.divf %496, %497 : vector<2x32xf32>
    %499 = vector.extract_strided_slice %492 {offsets = [0, 32], sizes = [2, 32], strides = [1, 1]} : vector<2x128xf32> to vector<2x32xf32>
    %500 = arith.negf %499 : vector<2x32xf32>
    %501 = math.exp %500 : vector<2x32xf32>
    %cst_225 = arith.constant 1.000000e+00 : f32
    %502 = vector.broadcast %cst_225 : f32 to vector<2x32xf32>
    %503 = arith.addf %502, %501 : vector<2x32xf32>
    %504 = arith.divf %502, %503 : vector<2x32xf32>
    %505 = vector.extract_strided_slice %492 {offsets = [0, 64], sizes = [2, 32], strides = [1, 1]} : vector<2x128xf32> to vector<2x32xf32>
    %506 = math.tanh %505 : vector<2x32xf32>
    %507 = vector.extract_strided_slice %492 {offsets = [0, 96], sizes = [2, 32], strides = [1, 1]} : vector<2x128xf32> to vector<2x32xf32>
    %508 = arith.negf %507 : vector<2x32xf32>
    %509 = math.exp %508 : vector<2x32xf32>
    %cst_226 = arith.constant 1.000000e+00 : f32
    %510 = vector.broadcast %cst_226 : f32 to vector<2x32xf32>
    %511 = arith.addf %510, %509 : vector<2x32xf32>
    %512 = arith.divf %510, %511 : vector<2x32xf32>
    %513 = arith.mulf %504, %485 : vector<2x32xf32>
    %514 = arith.mulf %498, %506 : vector<2x32xf32>
    %515 = arith.addf %513, %514 : vector<2x32xf32>
    %516 = math.tanh %515 : vector<2x32xf32>
    %517 = arith.mulf %512, %516 : vector<2x32xf32>
    %c4_227 = arith.constant 4 : index
    %c0_228 = arith.constant 0 : index
    %c0_229 = arith.constant 0 : index
    %518 = vector.load %arg11[%c4_227, %c0_228, %c0_229] : memref<8x2x128xf32, #tpu.memory_space<vmem>>, vector<1x2x128xf32>
    %519 = vector.shape_cast %518 : vector<1x2x128xf32> to vector<2x128xf32>
    %520 = arith.truncf %517 : vector<2x32xf32> to vector<2x32xbf16>
    %cst_230 = arith.constant dense<0.000000e+00> : vector<2x128xf32>
    %521 = tpu.matmul %520, %328, %cst_230 {dimension_numbers = #tpu.dot_dimension_numbers<[1], [0], [0], [1], [0, 0, 1, 1], [], []>} : vector<2x32xbf16>, vector<32x128xbf16>, vector<2x128xf32> -> vector<2x128xf32>
    %522 = arith.addf %519, %521 : vector<2x128xf32>
    %523 = vector.extract_strided_slice %522 {offsets = [0, 0], sizes = [2, 32], strides = [1, 1]} : vector<2x128xf32> to vector<2x32xf32>
    %524 = arith.negf %523 : vector<2x32xf32>
    %525 = math.exp %524 : vector<2x32xf32>
    %cst_231 = arith.constant 1.000000e+00 : f32
    %526 = vector.broadcast %cst_231 : f32 to vector<2x32xf32>
    %527 = arith.addf %526, %525 : vector<2x32xf32>
    %528 = arith.divf %526, %527 : vector<2x32xf32>
    %529 = vector.extract_strided_slice %522 {offsets = [0, 32], sizes = [2, 32], strides = [1, 1]} : vector<2x128xf32> to vector<2x32xf32>
    %530 = arith.negf %529 : vector<2x32xf32>
    %531 = math.exp %530 : vector<2x32xf32>
    %cst_232 = arith.constant 1.000000e+00 : f32
    %532 = vector.broadcast %cst_232 : f32 to vector<2x32xf32>
    %533 = arith.addf %532, %531 : vector<2x32xf32>
    %534 = arith.divf %532, %533 : vector<2x32xf32>
    %535 = vector.extract_strided_slice %522 {offsets = [0, 64], sizes = [2, 32], strides = [1, 1]} : vector<2x128xf32> to vector<2x32xf32>
    %536 = math.tanh %535 : vector<2x32xf32>
    %537 = vector.extract_strided_slice %522 {offsets = [0, 96], sizes = [2, 32], strides = [1, 1]} : vector<2x128xf32> to vector<2x32xf32>
    %538 = arith.negf %537 : vector<2x32xf32>
    %539 = math.exp %538 : vector<2x32xf32>
    %cst_233 = arith.constant 1.000000e+00 : f32
    %540 = vector.broadcast %cst_233 : f32 to vector<2x32xf32>
    %541 = arith.addf %540, %539 : vector<2x32xf32>
    %542 = arith.divf %540, %541 : vector<2x32xf32>
    %543 = arith.mulf %534, %515 : vector<2x32xf32>
    %544 = arith.mulf %528, %536 : vector<2x32xf32>
    %545 = arith.addf %543, %544 : vector<2x32xf32>
    %546 = math.tanh %545 : vector<2x32xf32>
    %547 = arith.mulf %542, %546 : vector<2x32xf32>
    %c5_234 = arith.constant 5 : index
    %c0_235 = arith.constant 0 : index
    %c0_236 = arith.constant 0 : index
    %548 = vector.load %arg11[%c5_234, %c0_235, %c0_236] : memref<8x2x128xf32, #tpu.memory_space<vmem>>, vector<1x2x128xf32>
    %549 = vector.shape_cast %548 : vector<1x2x128xf32> to vector<2x128xf32>
    %550 = arith.truncf %547 : vector<2x32xf32> to vector<2x32xbf16>
    %cst_237 = arith.constant dense<0.000000e+00> : vector<2x128xf32>
    %551 = tpu.matmul %550, %328, %cst_237 {dimension_numbers = #tpu.dot_dimension_numbers<[1], [0], [0], [1], [0, 0, 1, 1], [], []>} : vector<2x32xbf16>, vector<32x128xbf16>, vector<2x128xf32> -> vector<2x128xf32>
    %552 = arith.addf %549, %551 : vector<2x128xf32>
    %553 = vector.extract_strided_slice %552 {offsets = [0, 0], sizes = [2, 32], strides = [1, 1]} : vector<2x128xf32> to vector<2x32xf32>
    %554 = arith.negf %553 : vector<2x32xf32>
    %555 = math.exp %554 : vector<2x32xf32>
    %cst_238 = arith.constant 1.000000e+00 : f32
    %556 = vector.broadcast %cst_238 : f32 to vector<2x32xf32>
    %557 = arith.addf %556, %555 : vector<2x32xf32>
    %558 = arith.divf %556, %557 : vector<2x32xf32>
    %559 = vector.extract_strided_slice %552 {offsets = [0, 32], sizes = [2, 32], strides = [1, 1]} : vector<2x128xf32> to vector<2x32xf32>
    %560 = arith.negf %559 : vector<2x32xf32>
    %561 = math.exp %560 : vector<2x32xf32>
    %cst_239 = arith.constant 1.000000e+00 : f32
    %562 = vector.broadcast %cst_239 : f32 to vector<2x32xf32>
    %563 = arith.addf %562, %561 : vector<2x32xf32>
    %564 = arith.divf %562, %563 : vector<2x32xf32>
    %565 = vector.extract_strided_slice %552 {offsets = [0, 64], sizes = [2, 32], strides = [1, 1]} : vector<2x128xf32> to vector<2x32xf32>
    %566 = math.tanh %565 : vector<2x32xf32>
    %567 = vector.extract_strided_slice %552 {offsets = [0, 96], sizes = [2, 32], strides = [1, 1]} : vector<2x128xf32> to vector<2x32xf32>
    %568 = arith.negf %567 : vector<2x32xf32>
    %569 = math.exp %568 : vector<2x32xf32>
    %cst_240 = arith.constant 1.000000e+00 : f32
    %570 = vector.broadcast %cst_240 : f32 to vector<2x32xf32>
    %571 = arith.addf %570, %569 : vector<2x32xf32>
    %572 = arith.divf %570, %571 : vector<2x32xf32>
    %573 = arith.mulf %564, %545 : vector<2x32xf32>
    %574 = arith.mulf %558, %566 : vector<2x32xf32>
    %575 = arith.addf %573, %574 : vector<2x32xf32>
    %576 = math.tanh %575 : vector<2x32xf32>
    %577 = arith.mulf %572, %576 : vector<2x32xf32>
    %c6_241 = arith.constant 6 : index
    %c0_242 = arith.constant 0 : index
    %c0_243 = arith.constant 0 : index
    %578 = vector.load %arg11[%c6_241, %c0_242, %c0_243] : memref<8x2x128xf32, #tpu.memory_space<vmem>>, vector<1x2x128xf32>
    %579 = vector.shape_cast %578 : vector<1x2x128xf32> to vector<2x128xf32>
    %580 = arith.truncf %577 : vector<2x32xf32> to vector<2x32xbf16>
    %cst_244 = arith.constant dense<0.000000e+00> : vector<2x128xf32>
    %581 = tpu.matmul %580, %328, %cst_244 {dimension_numbers = #tpu.dot_dimension_numbers<[1], [0], [0], [1], [0, 0, 1, 1], [], []>} : vector<2x32xbf16>, vector<32x128xbf16>, vector<2x128xf32> -> vector<2x128xf32>
    %582 = arith.addf %579, %581 : vector<2x128xf32>
    %583 = vector.extract_strided_slice %582 {offsets = [0, 0], sizes = [2, 32], strides = [1, 1]} : vector<2x128xf32> to vector<2x32xf32>
    %584 = arith.negf %583 : vector<2x32xf32>
    %585 = math.exp %584 : vector<2x32xf32>
    %cst_245 = arith.constant 1.000000e+00 : f32
    %586 = vector.broadcast %cst_245 : f32 to vector<2x32xf32>
    %587 = arith.addf %586, %585 : vector<2x32xf32>
    %588 = arith.divf %586, %587 : vector<2x32xf32>
    %589 = vector.extract_strided_slice %582 {offsets = [0, 32], sizes = [2, 32], strides = [1, 1]} : vector<2x128xf32> to vector<2x32xf32>
    %590 = arith.negf %589 : vector<2x32xf32>
    %591 = math.exp %590 : vector<2x32xf32>
    %cst_246 = arith.constant 1.000000e+00 : f32
    %592 = vector.broadcast %cst_246 : f32 to vector<2x32xf32>
    %593 = arith.addf %592, %591 : vector<2x32xf32>
    %594 = arith.divf %592, %593 : vector<2x32xf32>
    %595 = vector.extract_strided_slice %582 {offsets = [0, 64], sizes = [2, 32], strides = [1, 1]} : vector<2x128xf32> to vector<2x32xf32>
    %596 = math.tanh %595 : vector<2x32xf32>
    %597 = vector.extract_strided_slice %582 {offsets = [0, 96], sizes = [2, 32], strides = [1, 1]} : vector<2x128xf32> to vector<2x32xf32>
    %598 = arith.negf %597 : vector<2x32xf32>
    %599 = math.exp %598 : vector<2x32xf32>
    %cst_247 = arith.constant 1.000000e+00 : f32
    %600 = vector.broadcast %cst_247 : f32 to vector<2x32xf32>
    %601 = arith.addf %600, %599 : vector<2x32xf32>
    %602 = arith.divf %600, %601 : vector<2x32xf32>
    %603 = arith.mulf %594, %575 : vector<2x32xf32>
    %604 = arith.mulf %588, %596 : vector<2x32xf32>
    %605 = arith.addf %603, %604 : vector<2x32xf32>
    %606 = math.tanh %605 : vector<2x32xf32>
    %607 = arith.mulf %602, %606 : vector<2x32xf32>
    %c7_248 = arith.constant 7 : index
    %c0_249 = arith.constant 0 : index
    %c0_250 = arith.constant 0 : index
    %608 = vector.load %arg11[%c7_248, %c0_249, %c0_250] : memref<8x2x128xf32, #tpu.memory_space<vmem>>, vector<1x2x128xf32>
    %609 = vector.shape_cast %608 : vector<1x2x128xf32> to vector<2x128xf32>
    %610 = arith.truncf %607 : vector<2x32xf32> to vector<2x32xbf16>
    %cst_251 = arith.constant dense<0.000000e+00> : vector<2x128xf32>
    %611 = tpu.matmul %610, %328, %cst_251 {dimension_numbers = #tpu.dot_dimension_numbers<[1], [0], [0], [1], [0, 0, 1, 1], [], []>} : vector<2x32xbf16>, vector<32x128xbf16>, vector<2x128xf32> -> vector<2x128xf32>
    %612 = arith.addf %609, %611 : vector<2x128xf32>
    %613 = vector.extract_strided_slice %612 {offsets = [0, 0], sizes = [2, 32], strides = [1, 1]} : vector<2x128xf32> to vector<2x32xf32>
    %614 = arith.negf %613 : vector<2x32xf32>
    %615 = math.exp %614 : vector<2x32xf32>
    %cst_252 = arith.constant 1.000000e+00 : f32
    %616 = vector.broadcast %cst_252 : f32 to vector<2x32xf32>
    %617 = arith.addf %616, %615 : vector<2x32xf32>
    %618 = arith.divf %616, %617 : vector<2x32xf32>
    %619 = vector.extract_strided_slice %612 {offsets = [0, 32], sizes = [2, 32], strides = [1, 1]} : vector<2x128xf32> to vector<2x32xf32>
    %620 = arith.negf %619 : vector<2x32xf32>
    %621 = math.exp %620 : vector<2x32xf32>
    %cst_253 = arith.constant 1.000000e+00 : f32
    %622 = vector.broadcast %cst_253 : f32 to vector<2x32xf32>
    %623 = arith.addf %622, %621 : vector<2x32xf32>
    %624 = arith.divf %622, %623 : vector<2x32xf32>
    %625 = vector.extract_strided_slice %612 {offsets = [0, 64], sizes = [2, 32], strides = [1, 1]} : vector<2x128xf32> to vector<2x32xf32>
    %626 = math.tanh %625 : vector<2x32xf32>
    %627 = vector.extract_strided_slice %612 {offsets = [0, 96], sizes = [2, 32], strides = [1, 1]} : vector<2x128xf32> to vector<2x32xf32>
    %628 = arith.negf %627 : vector<2x32xf32>
    %629 = math.exp %628 : vector<2x32xf32>
    %cst_254 = arith.constant 1.000000e+00 : f32
    %630 = vector.broadcast %cst_254 : f32 to vector<2x32xf32>
    %631 = arith.addf %630, %629 : vector<2x32xf32>
    %632 = arith.divf %630, %631 : vector<2x32xf32>
    %633 = arith.mulf %624, %605 : vector<2x32xf32>
    %634 = arith.mulf %618, %626 : vector<2x32xf32>
    %635 = arith.addf %633, %634 : vector<2x32xf32>
    %636 = math.tanh %635 : vector<2x32xf32>
    %637 = arith.mulf %632, %636 : vector<2x32xf32>
    %c0_255 = arith.constant 0 : index
    %c0_256 = arith.constant 0 : index
    %638 = vector.load %arg7[%c0_255, %c0_256] : memref<32x1xf32, #tpu.memory_space<vmem>>, vector<32x1xf32>
    %cst_257 = arith.constant dense<0.000000e+00> : vector<2x1xf32>
    %639 = tpu.matmul %637, %638, %cst_257 {dimension_numbers = #tpu.dot_dimension_numbers<[1], [0], [0], [1], [0, 0, 1, 1], [], []>} : vector<2x32xf32>, vector<32x1xf32>, vector<2x1xf32> -> vector<2x1xf32>
    %c0_258 = arith.constant 0 : index
    %c0_259 = arith.constant 0 : index
    %640 = vector.load %arg8[%c0_258, %c0_259] : memref<1x1xf32, #tpu.memory_space<vmem>>, vector<1x1xf32>
    %641 = vector.broadcast %640 : vector<1x1xf32> to vector<2x1xf32>
    %642 = arith.addf %639, %641 : vector<2x1xf32>
    %c0_260 = arith.constant 0 : index
    %c0_261 = arith.constant 0 : index
    %643 = vector.load %arg9[%c0_260, %c0_261] : memref<2x1xf32, #tpu.memory_space<vmem>>, vector<2x1xf32>
    tpu.vector_store %arg9[%c0_260, %c0_261], %642 {strides = array<i32>} : memref<2x1xf32, #tpu.memory_space<vmem>>, vector<2x1xf32>,
    return
  }
}

</mosaic_0001>

<bundles_post_ra>
// kernel: lstm_predictor_forward.1
= control target key start
LH: loop header
LB: loop body
LE: loop exit
PB: predicated region body
PF: predicated region fallthrough
CT: control target
= control target key end

     0   :  { %vm52_vm0 = vcmask 1041408   ;;  %v2689_v0 = vmov 0.0   ;;  %vm2690_vm1 = vmmov 0   ;;  %vm48_vm2 = vcmask 31744   ;;  %s2693_s23 = smov 32   ;;  %s3183_s1 = inlined_call_operand.vmem [shape: bf16[4,128], index: 1, kind: input, shape index: {}]   ;;  %s3184_s0 = inlined_call_operand.vmem [shape: bf16[8,2,4], index: 0, kind: input, shape index: {}]   ;;  %s3185_s2 = inlined_call_operand.vmem [shape: bf16[32,128], index: 2, kind: input, shape index: {}]   ;;  %s3186_s3 = inlined_call_operand.vmem [shape: f32[1,128], index: 3, kind: input, shape index: {}]   ;;  %s3187_s4 = inlined_call_operand.vmem [shape: bf16[32,128], index: 4, kind: input, shape index: {}]   ;;  %s3188_s5 = inlined_call_operand.vmem [shape: bf16[32,128], index: 5, kind: input, shape index: {}]   ;;  %s3189_s6 = inlined_call_operand.vmem [shape: f32[1,128], index: 6, kind: input, shape index: {}]   ;;  %s3190_s7 = inlined_call_operand.vmem [shape: f32[32,1], index: 7, kind: input, shape index: {}]   ;;  %s3191_s8 = inlined_call_operand.<no memory space> [shape: f32[1,1], index: 8, kind: input, shape index: {}]   ;;  %s3192_s9 = inlined_call_operand.vmem [shape: f32[2,1], index: 9, kind: output, shape index: {}]  }
   0x1   :  { %2299 = vmatprep.subr.bf16.mxu0 %v2689_v0  ;;  %v35_v1 = vld [vmem:[%s3183_s1] sm:$0x3]  ;;  %2301 = vmatprep.mubr.msk.bf16.mxu0 %vm2690_vm1, %v2689_v0  ;;  %v2147_v4 = vld [vmem:[%s3184_s0 + $0x2] sm:$0x1]  ;;  %v2151_v5 = vld [vmem:[%s3184_s0 + $0x4] sm:$0x1] }
   0x2   :  { %v2750_v2 = vsel %vm52_vm0, %v35_v1, 0  ;;  %v47_v3 = vld [vmem:[%s3184_s0] sm:$0x1]  ;;  %2305 = vmatprep.subr.bf16.mxu1 %v2689_v0  ;;  %2307 = vmatprep.mubr.msk.bf16.mxu1 %vm2690_vm1, %v2689_v0  ;;  %v2155_v6 = vld [vmem:[%s3184_s0 + $0x6] sm:$0x1]  ;;  %v2789_v7 = vld [vmem:[%s3185_s2 + $0x8] sm:$0xff]  }
   0x3   :  { %2300 = vmatpush3.bf16.msra.mxu0 %v2750_v2  ;;  %2306 = vmatpush3.bf16.msra.mxu1 %v2750_v2  ;;  %v2796_v8 = vld [vmem:[%s3185_s2] sm:$0xff]   ;;  %v2691_v9 = vmov 0   ;;  %vm439_vm3 = vcmask 261120   ;;  %vm512_vm4 = vcmask 254976   ;;  %vm2137_vm5 = vcmask 1024  }
   0x4   :  { %2311 = vmatprep.subr.bf16.mxu0 %v2689_v0  ;;  %2317 = vmatprep.subr.bf16.mxu1 %v2689_v0  ;;  %v2813_v10 = vld [vmem:[%s3186_s3] ss:$0 sm:$0xff]  ;;  %s2692_s3 = smov 64   ;;  %v2145_v47 = vld [vmem:[%s3184_s0 + $0x1] sm:$0x1] }
   0x5   :  { %v2149_v48 = vld [vmem:[%s3184_s0 + $0x3] sm:$0x1]  ;;  %v2153_v50 = vld [vmem:[%s3184_s0 + $0x5] sm:$0x1]  ;;  %v2157_v51 = vld [vmem:[%s3184_s0 + $0x7] sm:$0x1] }
   0x6   :  { %2302 = vmatmul.mubr.msk.bf16.vlgmr.msra.gmra.mxu0 %vm48_vm2, %v47_v3  ;;  %2308 = vmatmul.mubr.msk.bf16.vlgmr.msra.gmra.mxu1 %vm48_vm2, %v2145_v47 }
   0x7   :  { %2312 = vmatpush3.bf16.msra.mxu0 %v2750_v2  ;;  %2313 = vmatprep.mubr.msk.bf16.mxu0 %vm2690_vm1, %v2689_v0 }
   0x8   :  { %2323 = vmatprep.subr.bf16.mxu0 %v2689_v0  ;;  %2318 = vmatpush3.bf16.msra.mxu1 %v2750_v2 }
   0x9   :  { %2319 = vmatprep.mubr.msk.bf16.mxu1 %vm2690_vm1, %v2689_v0  ;;  %2329 = vmatprep.subr.bf16.mxu1 %v2689_v0 }
   0xe   :  { %2314 = vmatmul.mubr.msk.bf16.vlgmr.msra.gmra.mxu0 %vm48_vm2, %v2147_v4  ;;  %2320 = vmatmul.mubr.msk.bf16.vlgmr.msra.gmra.mxu1 %vm48_vm2, %v2149_v48 }
   0xf   :  { %2324 = vmatpush3.bf16.msra.mxu0 %v2750_v2  ;;  %2325 = vmatprep.mubr.msk.bf16.mxu0 %vm2690_vm1, %v2689_v0 }
  0x10   :  { %2335 = vmatprep.subr.bf16.mxu0 %v2689_v0  ;;  %2330 = vmatpush3.bf16.msra.mxu1 %v2750_v2 }
  0x11   :  { %2331 = vmatprep.mubr.msk.bf16.mxu1 %vm2690_vm1, %v2689_v0  ;;  %2341 = vmatprep.subr.bf16.mxu1 %v2689_v0 }
  0x16   :  { %2326 = vmatmul.mubr.msk.bf16.vlgmr.msra.gmra.mxu0 %vm48_vm2, %v2151_v5  ;;  %2332 = vmatmul.mubr.msk.bf16.vlgmr.msra.gmra.mxu1 %vm48_vm2, %v2153_v50 }
  0x17   :  { %2336 = vmatpush3.bf16.msra.mxu0 %v2750_v2  ;;  %2337 = vmatprep.mubr.msk.bf16.mxu0 %vm2690_vm1, %v2689_v0 }
  0x18   :  { %2347 = vmatprep.subr.bf16.mxu0 %v2689_v0  ;;  %2342 = vmatpush3.bf16.msra.mxu1 %v2750_v2 }
  0x19   :  { %2343 = vmatprep.mubr.msk.bf16.mxu1 %vm2690_vm1, %v2689_v0  ;;  %2355 = vmatprep.subr.bf16.mxu1 %v2689_v0 }
  0x1e   :  { %2338 = vmatmul.mubr.msk.bf16.vlgmr.msra.gmra.mxu0 %vm48_vm2, %v2155_v6  ;;  %2344 = vmatmul.mubr.msk.bf16.vlgmr.msra.gmra.mxu1 %vm48_vm2, %v2157_v51 }
  0x1f   :  { %2348 = vmatpush3.bf16.msra.mxu0 %v2789_v7  ;;  %2351 = vmatprep.mubr.msk.bf16.mxu0 %vm2690_vm1, %v2689_v0 }
  0x20   :  { %2349 = vmatprep.subr.bf16.mxu0 %v2689_v0  ;;  %2356 = vmatpush3.bf16.msra.mxu1 %v2789_v7 }
  0x21   :  { %2359 = vmatprep.mubr.msk.bf16.mxu1 %vm2690_vm1, %v2689_v0  ;;  %2357 = vmatprep.subr.bf16.mxu1 %v2689_v0 }
  0x23   :  { %2350 = vmatpush3.bf16.msra.mxu0 %v2796_v8 }
  0x24   :  { %2363 = vmatprep.subr.bf16.mxu0 %v2689_v0  ;;  %2358 = vmatpush3.bf16.msra.mxu1 %v2796_v8 }
  0x25   :  { %2371 = vmatprep.subr.bf16.mxu1 %v2689_v0 }
  0x26   :  { %2352 = vmatmul.mubr.bf16.vlgmr.msra.gmra.mxu0 %v2691_v9 }
  0x27   :  { %2364 = vmatpush3.bf16.msra.mxu0 %v2789_v7  ;;  %2367 = vmatprep.mubr.msk.bf16.mxu0 %vm2690_vm1, %v2689_v0 }
  0x28   :  { %2365 = vmatprep.subr.bf16.mxu0 %v2689_v0 }
  0x2b   :  { %2366 = vmatpush3.bf16.msra.mxu0 %v2796_v8 }
  0x2c   :  { %2379 = vmatprep.subr.bf16.mxu0 %v2689_v0 }
  0xc6   :  { %v90_v11 = vpop.f32.mrf.mxu0  ;;  %v136_v55 = vpop.f32.mrf.mxu1 }
  0xc7   :  { %v91_v12 = vadd.f32 %v2813_v10, %v90_v11  ;;  %v137_v56 = vadd.f32 %v2813_v10, %v136_v55 }
  0xc8   :  { %v2303_v13 = vpop.f32.mrf.mxu0  ;;  %v2309_v57 = vpop.f32.mrf.mxu1 }
  0xc9   :  { %96 = vst [vmem:[#allocation3] sm:$0x3] %v91_v12  ;;  %143 = vst [vmem:[#allocation3 + $0x2] sm:$0x3] %v137_v56 }
  0xca   :  { %v93_v14 = vpop.f32.mrf.mxu0  ;;  %v139_v58 = vpop.f32.mrf.mxu1 }
  0xcc   :  { %v2304_v15 = vpop.f32.mrf.mxu0  ;;  %v2310_v59 = vpop.f32.mrf.mxu1 }
  0xce   :  { %v183_v16 = vpop.f32.mrf.mxu0  ;;  %v230_v60 = vpop.f32.mrf.mxu1 }
  0xcf   :  { %v184_v17 = vadd.f32 %v2813_v10, %v183_v16  ;;  %v231_v61 = vadd.f32 %v2813_v10, %v230_v60 }
  0xd0   :  { %v2315_v18 = vpop.f32.mrf.mxu0  ;;  %v426_v31 = vld [vmem:[#allocation3] sm:$0x3]  ;;  %v2321_v62 = vpop.f32.mrf.mxu1 }
  0xd1   :  { %190 = vst [vmem:[#allocation3 + $0x4] sm:$0x3] %v184_v17  ;;  %237 = vst [vmem:[#allocation3 + $0x6] sm:$0x3] %v231_v61 }
  0xd2   :  { %v186_v19 = vpop.f32.mrf.mxu0  ;;  %v233_v63 = vpop.f32.mrf.mxu1 }
  0xd4   :  { %v2316_v20 = vpop.f32.mrf.mxu0  ;;  %v2322_v1 = vpop.f32.mrf.mxu1 }
  0xd6   :  { %v277_v21 = vpop.f32.mrf.mxu0  ;;  %v324_v2 = vpop.f32.mrf.mxu1 }
  0xd7   :  { %v278_v22 = vadd.f32 %v2813_v10, %v277_v21  ;;  %v325_v3 = vadd.f32 %v2813_v10, %v324_v2 }
  0xd8   :  { %v2327_v23 = vpop.f32.mrf.mxu0  ;;  %v2333_v4 = vpop.f32.mrf.mxu1  ;;  %v672_v59 = vld [vmem:[#allocation3 + $0x6] sm:$0x3] }
  0xd9   :  { %284 = vst [vmem:[#allocation3 + $0x8] sm:$0x3] %v278_v22  ;;  %331 = vst [vmem:[#allocation3 + $0xa] sm:$0x3] %v325_v3 }
  0xda   :  { %v280_v24 = vpop.f32.mrf.mxu0  ;;  %v327_v5 = vpop.f32.mrf.mxu1 }
  0xdc   :  { %v2328_v25 = vpop.f32.mrf.mxu0  ;;  %v2334_v6 = vpop.f32.mrf.mxu1 }
  0xde   :  { %v371_v26 = vpop.f32.mrf.mxu0  ;;  %v418_v11 = vpop.f32.mrf.mxu1 }
  0xdf   :  { %v372_v27 = vadd.f32 %v2813_v10, %v371_v26  ;;  %v419_v12 = vadd.f32 %v2813_v10, %v418_v11  ;;  %v514_v10 = vld [vmem:[#allocation3 + $0x2] sm:$0x3] }
  0xe0   :  { %v2339_v28 = vpop.f32.mrf.mxu0  ;;  %v2345_v13 = vpop.f32.mrf.mxu1 }
  0xe1   :  { %378 = vst [vmem:[#allocation3 + $0xc] sm:$0x3] %v372_v27  ;;  %425 = vst [vmem:[#allocation3 + $0xe] sm:$0x3] %v419_v12 }
  0xe2   :  { %v374_v29 = vpop.f32.mrf.mxu0  ;;  %v421_v14 = vpop.f32.mrf.mxu1 }
  0xe4   :  { %v2340_v30 = vpop.f32.mrf.mxu0  ;;  %v2346_v15 = vpop.f32.mrf.mxu1 }
  0xe6   :  { %v477_v32 = vpop.f32.mrf.mxu0 }
  0xe7   :  { %v483_v33 = vadd.f32 %v477_v32, %v426_v31 }
  0xe8   :  { %v2353_v34 = vpop.f32.mrf.mxu0 }
  0xe9   :  { %2561 = vtanh.f32 %v483_v33  ;;  %v2161_v38 = vmul.f32 -1.442695, %v483_v33 }
  0xea   :  { %v480_v35 = vpop.f32.mrf.mxu0 }
  0xeb   :  { %2563 = vpow2.f32 %v2161_v38 }
  0xec   :  { %v2354_v36 = vpop.f32.mrf.mxu0 }
  0xf6   :  { %v2562_v37 = vpop.eup %2561 }
  0xf7   :  { %493 = vrot.lane.b32.xlu0 %v2562_v37, %s2692_s3  ;;  %v593_v37 = vld [vmem:[#allocation3 + $0x4] sm:$0x3] }
  0xf8   :  { %v2564_v39 = vpop.eup %2563 }
  0xf9   :  { %v487_v40 = vadd.f32 1.0, %v2564_v39 }
  0xfb   :  { %2565 = vrcp.f32 %v487_v40 }
 0x108   :  { %v2566_v41 = vpop.eup %2565 }
 0x109   :  { %v491_v44 = vmul.f32 0.0, %v2566_v41 }
 0x169   :  { %v494_v42 = vpop.permute.xlu0 %493 }
 0x16a   :  { %v496_v43 = vmul.f32 %v2566_v41, %v494_v42 }
 0x16c   :  { %498 = vrot.lane.b32.xlu0 %v496_v43, %s2693_s23 }
 0x1de   :  { %v499_v45 = vpop.permute.xlu0 %498 }
 0x1df   :  { %v2821_v46 = vadd.f32 %v499_v45, %v491_v44 }
 0x1e1   :  { %2567 = vtanh.f32 %v2821_v46 }
 0x1ee   :  { %v2568_v49 = vpop.eup %2567 }
 0x1ef   :  { %504 = vrot.lane.b32.xlu1 %v2568_v49, %s2692_s3 }
 0x261   :  { %v505_v52 = vpop.permute.xlu1 %504 }
 0x262   :  { %v2859_v53 = vmul.f32 %v2566_v41, %v505_v52 }
 0x264   :  { %v515_v54 = vpack.c.bf16 %v2859_v53, %v2859_v53 }
 0x266   :  { %517 = vrot.lane.b32.xlu1 %v515_v54, %s2693_s23 }
 0x2d8   :  { %v518_v16 = vpop.permute.xlu1 %517 }
 0x2d9   :  { %2360 = vmatmul.mubr.msk.bf16.vlgmr.msra.gmra.mxu1 %vm439_vm3, %v518_v16 }
 0x2da   :  { %2372 = vmatpush3.bf16.msra.mxu1 %v2789_v7  ;;  %2375 = vmatprep.mubr.msk.bf16.mxu1 %vm2690_vm1, %v2689_v0 }
 0x2db   :  { %2373 = vmatprep.subr.bf16.mxu1 %v2689_v0 }
 0x2de   :  { %2374 = vmatpush3.bf16.msra.mxu1 %v2796_v8 }
 0x2df   :  { %2387 = vmatprep.subr.bf16.mxu1 %v2689_v0 }
 0x399   :  { %v556_v17 = vpop.f32.mrf.mxu1 }
 0x39a   :  { %v562_v18 = vadd.f32 %v556_v17, %v514_v10 }
 0x39b   :  { %v2361_v19 = vpop.f32.mrf.mxu1 }
 0x39c   :  { %2569 = vtanh.f32 %v562_v18  ;;  %v2163_v23 = vmul.f32 -1.442695, %v562_v18 }
 0x39d   :  { %v559_v20 = vpop.f32.mrf.mxu1 }
 0x39e   :  { %2571 = vpow2.f32 %v2163_v23  ;;  %v751_v20 = vld [vmem:[#allocation3 + $0x8] sm:$0x3] }
 0x39f   :  { %v2362_v21 = vpop.f32.mrf.mxu1 }
 0x3a9   :  { %v2570_v22 = vpop.eup %2569 }
 0x3aa   :  { %572 = vrot.lane.b32.xlu0 %v2570_v22, %s2692_s3 }
 0x3ab   :  { %v2572_v24 = vpop.eup %2571 }
 0x3ac   :  { %v566_v25 = vadd.f32 1.0, %v2572_v24 }
 0x3ae   :  { %2573 = vrcp.f32 %v566_v25 }
 0x3bb   :  { %v2574_v26 = vpop.eup %2573 }
 0x3bc   :  { %v570_v29 = vmul.f32 %v2574_v26, %v2821_v46 }
 0x41c   :  { %v573_v27 = vpop.permute.xlu0 %572 }
 0x41d   :  { %v575_v28 = vmul.f32 %v2574_v26, %v573_v27 }
 0x41f   :  { %577 = vrot.lane.b32.xlu1 %v575_v28, %s2693_s23 }
 0x491   :  { %v578_v30 = vpop.permute.xlu1 %577 }
 0x492   :  { %v580_v31 = vadd.f32 %v578_v30, %v570_v29 }
 0x494   :  { %2575 = vtanh.f32 %v580_v31 }
 0x4a1   :  { %v2576_v32 = vpop.eup %2575 }
 0x4a2   :  { %583 = vrot.lane.b32.xlu0 %v2576_v32, %s2692_s3 }
 0x514   :  { %v584_v33 = vpop.permute.xlu0 %583 }
 0x515   :  { %v2879_v34 = vmul.f32 %v2574_v26, %v584_v33 }
 0x517   :  { %v594_v35 = vpack.c.bf16 %v2879_v34, %v2879_v34 }
 0x519   :  { %596 = vrot.lane.b32.xlu1 %v594_v35, %s2693_s23 }
 0x58b   :  { %v597_v36 = vpop.permute.xlu1 %596 }
 0x58c   :  { %2368 = vmatmul.mubr.msk.bf16.vlgmr.msra.gmra.mxu0 %vm439_vm3, %v597_v36 }
 0x58d   :  { %2380 = vmatpush3.bf16.msra.mxu0 %v2789_v7  ;;  %2383 = vmatprep.mubr.msk.bf16.mxu0 %vm2690_vm1, %v2689_v0 }
 0x58e   :  { %2381 = vmatprep.subr.bf16.mxu0 %v2689_v0 }
 0x591   :  { %2382 = vmatpush3.bf16.msra.mxu0 %v2796_v8 }
 0x592   :  { %2395 = vmatprep.subr.bf16.mxu0 %v2689_v0 }
 0x64c   :  { %v635_v38 = vpop.f32.mrf.mxu0 }
 0x64d   :  { %v641_v39 = vadd.f32 %v635_v38, %v593_v37 }
 0x64e   :  { %v2369_v40 = vpop.f32.mrf.mxu0 }
 0x64f   :  { %2577 = vtanh.f32 %v641_v39  ;;  %v2165_v44 = vmul.f32 -1.442695, %v641_v39 }
 0x650   :  { %v638_v41 = vpop.f32.mrf.mxu0 }
 0x651   :  { %2579 = vpow2.f32 %v2165_v44 }
 0x652   :  { %v2370_v42 = vpop.f32.mrf.mxu0 }
 0x653   :  { %v830_v42 = vld [vmem:[#allocation3 + $0xa] sm:$0x3] }
 0x65c   :  { %v2578_v43 = vpop.eup %2577 }
 0x65d   :  { %651 = vrot.lane.b32.xlu0 %v2578_v43, %s2692_s3 }
 0x65e   :  { %v2580_v45 = vpop.eup %2579 }
 0x65f   :  { %v645_v46 = vadd.f32 1.0, %v2580_v45 }
 0x661   :  { %2581 = vrcp.f32 %v645_v46 }
 0x66e   :  { %v2582_v47 = vpop.eup %2581 }
 0x66f   :  { %v649_v50 = vmul.f32 %v2582_v47, %v580_v31 }
 0x6cf   :  { %v652_v48 = vpop.permute.xlu0 %651 }
 0x6d0   :  { %v654_v49 = vmul.f32 %v2582_v47, %v652_v48 }
 0x6d2   :  { %656 = vrot.lane.b32.xlu1 %v654_v49, %s2693_s23 }
 0x744   :  { %v657_v51 = vpop.permute.xlu1 %656 }
 0x745   :  { %v659_v52 = vadd.f32 %v657_v51, %v649_v50 }
 0x747   :  { %2583 = vtanh.f32 %v659_v52 }
 0x754   :  { %v2584_v54 = vpop.eup %2583 }
 0x755   :  { %662 = vrot.lane.b32.xlu0 %v2584_v54, %s2692_s3 }
 0x7c7   :  { %v663_v55 = vpop.permute.xlu0 %662 }
 0x7c8   :  { %v2894_v56 = vmul.f32 %v2582_v47, %v663_v55 }
 0x7ca   :  { %v673_v57 = vpack.c.bf16 %v2894_v56, %v2894_v56 }
 0x7cc   :  { %675 = vrot.lane.b32.xlu1 %v673_v57, %s2693_s23 }
 0x83e   :  { %v676_v58 = vpop.permute.xlu1 %675 }
 0x83f   :  { %2376 = vmatmul.mubr.msk.bf16.vlgmr.msra.gmra.mxu1 %vm439_vm3, %v676_v58 }
 0x840   :  { %2388 = vmatpush3.bf16.msra.mxu1 %v2789_v7  ;;  %2391 = vmatprep.mubr.msk.bf16.mxu1 %vm2690_vm1, %v2689_v0 }
 0x841   :  { %2389 = vmatprep.subr.bf16.mxu1 %v2689_v0 }
 0x844   :  { %2390 = vmatpush3.bf16.msra.mxu1 %v2796_v8 }
 0x845   :  { %2403 = vmatprep.subr.bf16.mxu1 %v2689_v0 }
 0x8ff   :  { %v714_v60 = vpop.f32.mrf.mxu1 }
 0x900   :  { %v720_v61 = vadd.f32 %v714_v60, %v672_v59 }
 0x901   :  { %v2377_v62 = vpop.f32.mrf.mxu1 }
 0x902   :  { %2585 = vtanh.f32 %v720_v61  ;;  %v2167_v3 = vmul.f32 -1.442695, %v720_v61 }
 0x903   :  { %v717_v63 = vpop.f32.mrf.mxu1 }
 0x904   :  { %2587 = vpow2.f32 %v2167_v3  ;;  %v909_v63 = vld [vmem:[#allocation3 + $0xc] sm:$0x3] }
 0x905   :  { %v2378_v1 = vpop.f32.mrf.mxu1 }
 0x90f   :  { %v2586_v2 = vpop.eup %2585 }
 0x910   :  { %730 = vrot.lane.b32.xlu0 %v2586_v2, %s2692_s3 }
 0x911   :  { %v2588_v4 = vpop.eup %2587 }
 0x912   :  { %v724_v5 = vadd.f32 1.0, %v2588_v4 }
 0x914   :  { %2589 = vrcp.f32 %v724_v5 }
 0x921   :  { %v2590_v6 = vpop.eup %2589 }
 0x922   :  { %v728_v13 = vmul.f32 %v2590_v6, %v659_v52 }
 0x982   :  { %v731_v11 = vpop.permute.xlu0 %730 }
 0x983   :  { %v733_v12 = vmul.f32 %v2590_v6, %v731_v11 }
 0x985   :  { %735 = vrot.lane.b32.xlu1 %v733_v12, %s2693_s23 }
 0x9f7   :  { %v736_v14 = vpop.permute.xlu1 %735 }
 0x9f8   :  { %v738_v15 = vadd.f32 %v736_v14, %v728_v13  ;;  %v2951_v14 = vld [vmem:[%s3187_s4 + $0x8] sm:$0xff]  }
 0x9fa   :  { %2591 = vtanh.f32 %v738_v15 }
 0xa07   :  { %v2592_v16 = vpop.eup %2591 }
 0xa08   :  { %741 = vrot.lane.b32.xlu0 %v2592_v16, %s2692_s3 }
 0xa7a   :  { %v742_v10 = vpop.permute.xlu0 %741 }
 0xa7b   :  { %v2909_v17 = vmul.f32 %v2590_v6, %v742_v10 }
 0xa7d   :  { %v752_v18 = vpack.c.bf16 %v2909_v17, %v2909_v17 }
 0xa7f   :  { %754 = vrot.lane.b32.xlu1 %v752_v18, %s2693_s23 }
 0xaf1   :  { %v755_v19 = vpop.permute.xlu1 %754 }
 0xaf2   :  { %2384 = vmatmul.mubr.msk.bf16.vlgmr.msra.gmra.mxu0 %vm439_vm3, %v755_v19 }
 0xaf3   :  { %2396 = vmatpush3.bf16.msra.mxu0 %v2789_v7  ;;  %2399 = vmatprep.mubr.msk.bf16.mxu0 %vm2690_vm1, %v2689_v0 }
 0xaf4   :  { %2397 = vmatprep.subr.bf16.mxu0 %v2689_v0 }
 0xaf7   :  { %2398 = vmatpush3.bf16.msra.mxu0 %v2796_v8 }
 0xaf8   :  { %2411 = vmatprep.subr.bf16.mxu0 %v2689_v0 }
 0xbb2   :  { %v793_v21 = vpop.f32.mrf.mxu0 }
 0xbb3   :  { %v799_v22 = vadd.f32 %v793_v21, %v751_v20 }
 0xbb4   :  { %v2385_v23 = vpop.f32.mrf.mxu0 }
 0xbb5   :  { %2593 = vtanh.f32 %v799_v22  ;;  %v2169_v27 = vmul.f32 -1.442695, %v799_v22 }
 0xbb6   :  { %v796_v24 = vpop.f32.mrf.mxu0 }
 0xbb7   :  { %2595 = vpow2.f32 %v2169_v27 }
 0xbb8   :  { %v2386_v25 = vpop.f32.mrf.mxu0 }
 0xbc2   :  { %v2594_v26 = vpop.eup %2593 }
 0xbc3   :  { %809 = vrot.lane.b32.xlu0 %v2594_v26, %s2692_s3 }
 0xbc4   :  { %v2596_v28 = vpop.eup %2595 }
 0xbc5   :  { %v803_v29 = vadd.f32 1.0, %v2596_v28 }
 0xbc7   :  { %2597 = vrcp.f32 %v803_v29 }
 0xbd4   :  { %v2598_v30 = vpop.eup %2597 }
 0xbd5   :  { %v807_v33 = vmul.f32 %v2598_v30, %v738_v15  ;;  %v2958_v15 = vld [vmem:[%s3187_s4] sm:$0xff]  }
 0xc35   :  { %v810_v31 = vpop.permute.xlu0 %809 }
 0xc36   :  { %v812_v32 = vmul.f32 %v2598_v30, %v810_v31 }
 0xc38   :  { %814 = vrot.lane.b32.xlu1 %v812_v32, %s2693_s23 }
 0xcaa   :  { %v815_v35 = vpop.permute.xlu1 %814 }
 0xcab   :  { %v817_v36 = vadd.f32 %v815_v35, %v807_v33  ;;  %v3002_v33 = vld [vmem:[%s3189_s6] ss:$0 sm:$0xff] }
 0xcad   :  { %2599 = vtanh.f32 %v817_v36 }
 0xcba   :  { %v2600_v37 = vpop.eup %2599 }
 0xcbb   :  { %820 = vrot.lane.b32.xlu0 %v2600_v37, %s2692_s3 }
 0xd2d   :  { %v821_v38 = vpop.permute.xlu0 %820 }
 0xd2e   :  { %v2924_v39 = vmul.f32 %v2598_v30, %v821_v38 }
 0xd30   :  { %v831_v40 = vpack.c.bf16 %v2924_v39, %v2924_v39 }
 0xd32   :  { %833 = vrot.lane.b32.xlu1 %v831_v40, %s2693_s23 }
 0xda4   :  { %v834_v41 = vpop.permute.xlu1 %833 }
 0xda5   :  { %2392 = vmatmul.mubr.msk.bf16.vlgmr.msra.gmra.mxu1 %vm439_vm3, %v834_v41 }
 0xda6   :  { %2404 = vmatpush3.bf16.msra.mxu1 %v2789_v7  ;;  %2407 = vmatprep.mubr.msk.bf16.mxu1 %vm2690_vm1, %v2689_v0 }
 0xda7   :  { %2405 = vmatprep.subr.bf16.mxu1 %v2689_v0 }
 0xdaa   :  { %2406 = vmatpush3.bf16.msra.mxu1 %v2796_v8 }
 0xdab   :  { %2419 = vmatprep.subr.bf16.mxu1 %v2689_v0 }
 0xe65   :  { %v872_v43 = vpop.f32.mrf.mxu1 }
 0xe66   :  { %v878_v44 = vadd.f32 %v872_v43, %v830_v42  ;;  %v3014_v43 = vld [vmem:[%s3188_s5 + $0x8] sm:$0xff]  }
 0xe67   :  { %v2393_v45 = vpop.f32.mrf.mxu1 }
 0xe68   :  { %2601 = vtanh.f32 %v878_v44  ;;  %v2171_v7 = vmul.f32 -1.442695, %v878_v44  ;;  %v3023_v45 = vld [vmem:[%s3188_s5] sm:$0xff]  }
 0xe69   :  { %v875_v46 = vpop.f32.mrf.mxu1 }
 0xe6a   :  { %2603 = vpow2.f32 %v2171_v7 }
 0xe6b   :  { %v2394_v47 = vpop.f32.mrf.mxu1 }
 0xe75   :  { %v2602_v48 = vpop.eup %2601 }
 0xe76   :  { %888 = vrot.lane.b32.xlu0 %v2602_v48, %s2692_s3 }
 0xe77   :  { %v2604_v49 = vpop.eup %2603 }
 0xe78   :  { %v882_v50 = vadd.f32 1.0, %v2604_v49 }
 0xe7a   :  { %2605 = vrcp.f32 %v882_v50 }
 0xe87   :  { %v2606_v51 = vpop.eup %2605 }
 0xe88   :  { %v886_v54 = vmul.f32 %v2606_v51, %v817_v36 }
 0xee8   :  { %v889_v52 = vpop.permute.xlu0 %888 }
 0xee9   :  { %v891_v8 = vmul.f32 %v2606_v51, %v889_v52 }
 0xeeb   :  { %893 = vrot.lane.b32.xlu1 %v891_v8, %s2693_s23 }
 0xf5d   :  { %v894_v55 = vpop.permute.xlu1 %893 }
 0xf5e   :  { %v896_v57 = vadd.f32 %v894_v55, %v886_v54  ;;  %v988_v54 = vld [vmem:[#allocation3 + $0xe] sm:$0x3] }
 0xf60   :  { %2607 = vtanh.f32 %v896_v57 }
 0xf6d   :  { %v2608_v58 = vpop.eup %2607 }
 0xf6e   :  { %899 = vrot.lane.b32.xlu0 %v2608_v58, %s2692_s3 }
 0xfe0   :  { %v900_v59 = vpop.permute.xlu0 %899 }
 0xfe1   :  { %v2939_v60 = vmul.f32 %v2606_v51, %v900_v59 }
 0xfe3   :  { %v910_v61 = vpack.c.bf16 %v2939_v60, %v2939_v60 }
 0xfe5   :  { %912 = vrot.lane.b32.xlu1 %v910_v61, %s2693_s23 }
0x1057   :  { %v913_v62 = vpop.permute.xlu1 %912 }
0x1058   :  { %2400 = vmatmul.mubr.msk.bf16.vlgmr.msra.gmra.mxu0 %vm439_vm3, %v913_v62 }
0x1059   :  { %2415 = vmatprep.mubr.msk.bf16.mxu0 %vm2690_vm1, %v2689_v0  ;;  %2412 = vmatpush3.bf16.msra.mxu0 %v2951_v14 }
0x105a   :  { %2413 = vmatprep.subr.bf16.mxu0 %v2689_v0 }
0x105d   :  { %2414 = vmatpush3.bf16.msra.mxu0 %v2958_v15 }
0x105e   :  { %2427 = vmatprep.subr.bf16.mxu0 %v2689_v0 }
0x1118   :  { %v951_v1 = vpop.f32.mrf.mxu0 }
0x1119   :  { %v957_v2 = vadd.f32 %v951_v1, %v909_v63 }
0x111a   :  { %v2401_v3 = vpop.f32.mrf.mxu0 }
0x111b   :  { %2609 = vtanh.f32 %v957_v2  ;;  %v2173_v11 = vmul.f32 -1.442695, %v957_v2 }
0x111c   :  { %v954_v4 = vpop.f32.mrf.mxu0 }
0x111d   :  { %2611 = vpow2.f32 %v2173_v11 }
0x111e   :  { %v2402_v5 = vpop.f32.mrf.mxu0 }
0x1128   :  { %v2610_v6 = vpop.eup %2609 }
0x1129   :  { %967 = vrot.lane.b32.xlu0 %v2610_v6, %s2692_s3 }
0x112a   :  { %v2612_v12 = vpop.eup %2611 }
0x112b   :  { %v961_v13 = vadd.f32 1.0, %v2612_v12 }
0x112d   :  { %2613 = vrcp.f32 %v961_v13 }
0x113a   :  { %v2614_v16 = vpop.eup %2613 }
0x113b   :  { %v965_v19 = vmul.f32 %v2614_v16, %v896_v57 }
0x119b   :  { %v968_v10 = vpop.permute.xlu0 %967 }
0x119c   :  { %v970_v18 = vmul.f32 %v2614_v16, %v968_v10 }
0x119e   :  { %972 = vrot.lane.b32.xlu1 %v970_v18, %s2693_s23 }
0x11a2   :  { %509 = vrot.lane.b32.xlu1 %v2859_v53, %s2693_s23 }
0x11a6   :  { %825 = vrot.lane.b32.xlu1 %v2924_v39, %s2693_s23 }
0x1210   :  { %v973_v20 = vpop.permute.xlu1 %972 }
0x1211   :  { %v2967_v21 = vadd.f32 %v973_v20, %v965_v19 }
0x1213   :  { %2615 = vtanh.f32 %v2967_v21 }
0x1214   :  { %v510_v22 = vpop.permute.xlu1 %509 }
0x1215   :  { %513 = vst.msk [vmem:[#allocation2] sm:$0x3] %vm512_vm4, %v510_v22 }
0x1218   :  { %v826_v23 = vpop.permute.xlu1 %825 }
0x1219   :  { %829 = vst.msk [vmem:[#allocation2 + $0x8] sm:$0x3] %vm512_vm4, %v826_v23 }
0x121c   :  { %v1082_v24 = vld [vmem:[#allocation2] sm:$0x3] }
0x121d   :  { %v1083_v25 = vpack.c.bf16 %v1082_v24, %v1082_v24 }
0x121f   :  { %2416 = vmatmul.mubr.msk.bf16.vlgmr.msra.gmra.mxu0 %vm439_vm3, %v1083_v25 }
0x1220   :  { %v2616_v53 = vpop.eup %2615  ;;  %2428 = vmatpush3.bf16.msra.mxu0 %v2951_v14  ;;  %2431 = vmatprep.mubr.msk.bf16.mxu0 %vm2690_vm1, %v2689_v0 }
0x1221   :  { %978 = vrot.lane.b32.xlu0 %v2616_v53, %s2692_s3  ;;  %2429 = vmatprep.subr.bf16.mxu0 %v2689_v0 }
0x1224   :  { %2430 = vmatpush3.bf16.msra.mxu0 %v2958_v15 }
0x1225   :  { %667 = vrot.lane.b32.xlu0 %v2894_v56, %s2693_s23  ;;  %2443 = vmatprep.subr.bf16.mxu0 %v2689_v0  ;;  %v1278_v56 = vld [vmem:[#allocation2 + $0x8] sm:$0x3] }
0x1226   :  { %v1279_v32 = vpack.c.bf16 %v1278_v56, %v1278_v56 }
0x1293   :  { %v979_v26 = vpop.permute.xlu0 %978 }
0x1294   :  { %v981_v27 = vmul.f32 %v2614_v16, %v979_v26 }
0x1296   :  { %v989_v28 = vpack.c.bf16 %v981_v27, %v981_v27  ;;  %983 = vrot.lane.b32.xlu0 %v981_v27, %s2693_s23 }
0x1297   :  { %v668_v29 = vpop.permute.xlu0 %667 }
0x1298   :  { %671 = vst.msk [vmem:[#allocation2 + $0x4] sm:$0x3] %vm512_vm4, %v668_v29  ;;  %991 = vrot.lane.b32.xlu1 %v989_v28, %s2693_s23 }
0x129f   :  { %v1186_v30 = vld [vmem:[#allocation2 + $0x4] sm:$0x3] }
0x12a0   :  { %v1187_v31 = vpack.c.bf16 %v1186_v30, %v1186_v30 }
0x12a2   :  { %2432 = vmatmul.mubr.msk.bf16.vlgmr.msra.gmra.mxu0 %vm439_vm3, %v1187_v31 }
0x12a3   :  { %2444 = vmatpush3.bf16.msra.mxu0 %v2951_v14  ;;  %2447 = vmatprep.mubr.msk.bf16.mxu0 %vm2690_vm1, %v2689_v0 }
0x12a4   :  { %2445 = vmatprep.subr.bf16.mxu0 %v2689_v0 }
0x12a7   :  { %2446 = vmatpush3.bf16.msra.mxu0 %v2958_v15 }
0x12a8   :  { %2459 = vmatprep.subr.bf16.mxu0 %v2689_v0 }
0x12aa   :  { %2448 = vmatmul.mubr.msk.bf16.vlgmr.msra.gmra.mxu0 %vm439_vm3, %v1279_v32 }
0x12ab   :  { %2460 = vmatpush3.bf16.msra.mxu0 %v2951_v14  ;;  %2463 = vmatprep.mubr.msk.bf16.mxu0 %vm2690_vm1, %v2689_v0 }
0x12ac   :  { %2461 = vmatprep.subr.bf16.mxu0 %v2689_v0 }
0x12af   :  { %2462 = vmatpush3.bf16.msra.mxu0 %v2958_v15 }
0x12b0   :  { %2475 = vmatprep.subr.bf16.mxu0 %v2689_v0 }
0x12df   :  { %v1133_v35 = vpop.f32.mrf.mxu0 }
0x12e0   :  { %v1134_v36 = vadd.f32 %v3002_v33, %v1133_v35 }
0x12e1   :  { %v2417_v37 = vpop.f32.mrf.mxu0 }
0x12e2   :  { %1139 = vst [vmem:[#allocation3] sm:$0x3] %v1134_v36 }
0x12e3   :  { %v1136_v38 = vpop.f32.mrf.mxu0 }
0x12e5   :  { %v2418_v39 = vpop.f32.mrf.mxu0 }
0x12e9   :  { %v1462_v5 = vld [vmem:[#allocation3] sm:$0x3] }
0x1308   :  { %v984_v40 = vpop.permute.xlu0 %983 }
0x1309   :  { %987 = vst.msk [vmem:[#allocation2 + $0xc] sm:$0x3] %vm512_vm4, %v984_v40 }
0x130a   :  { %v992_v41 = vpop.permute.xlu1 %991 }
0x130b   :  { %2408 = vmatmul.mubr.msk.bf16.vlgmr.msra.gmra.mxu1 %vm439_vm3, %v992_v41 }
0x130c   :  { %2420 = vmatpush3.bf16.msra.mxu1 %v2951_v14  ;;  %2423 = vmatprep.mubr.msk.bf16.mxu1 %vm2690_vm1, %v2689_v0 }
0x130d   :  { %2421 = vmatprep.subr.bf16.mxu1 %v2689_v0 }
0x1310   :  { %v1370_v42 = vld [vmem:[#allocation2 + $0xc] sm:$0x3]  ;;  %2422 = vmatpush3.bf16.msra.mxu1 %v2958_v15 }
0x1311   :  { %v1371_v44 = vpack.c.bf16 %v1370_v42, %v1370_v42  ;;  %2435 = vmatprep.subr.bf16.mxu1 %v2689_v0 }
0x1313   :  { %2464 = vmatmul.mubr.msk.bf16.vlgmr.msra.gmra.mxu0 %vm439_vm3, %v1371_v44 }
0x1314   :  { %2476 = vmatpush3.bf16.msra.mxu0 %v3014_v43  ;;  %2479 = vmatprep.mubr.msk.bf16.mxu0 %vm2690_vm1, %v2689_v0 }
0x1315   :  { %2477 = vmatprep.subr.bf16.mxu0 %v2689_v0 }
0x1318   :  { %2478 = vmatpush3.bf16.msra.mxu0 %v3023_v45 }
0x1319   :  { %2491 = vmatprep.subr.bf16.mxu0 %v2689_v0 }
0x131b   :  { %2480 = vmatmul.mubr.bf16.vlgmr.msra.gmra.mxu0 %v2691_v9 }
0x131c   :  { %2492 = vmatpush3.bf16.msra.mxu0 %v3014_v43  ;;  %2495 = vmatprep.mubr.msk.bf16.mxu0 %vm2690_vm1, %v2689_v0 }
0x131d   :  { %2493 = vmatprep.subr.bf16.mxu0 %v2689_v0 }
0x1320   :  { %2494 = vmatpush3.bf16.msra.mxu0 %v3023_v45 }
0x1321   :  { %2507 = vmatprep.subr.bf16.mxu0 %v2689_v0 }
0x1362   :  { %v1225_v46 = vpop.f32.mrf.mxu0 }
0x1363   :  { %v1226_v47 = vadd.f32 %v3002_v33, %v1225_v46 }
0x1364   :  { %v2433_v48 = vpop.f32.mrf.mxu0 }
0x1365   :  { %1231 = vst [vmem:[#allocation3 + $0x4] sm:$0x3] %v1226_v47 }
0x1366   :  { %v1228_v7 = vpop.f32.mrf.mxu0 }
0x1368   :  { %v2434_v49 = vpop.f32.mrf.mxu0 }
0x136a   :  { %v1317_v50 = vpop.f32.mrf.mxu0 }
0x136b   :  { %v1318_v9 = vadd.f32 %v3002_v33, %v1317_v50 }
0x136c   :  { %v2449_v51 = vpop.f32.mrf.mxu0 }
0x136d   :  { %1323 = vst [vmem:[#allocation3 + $0x8] sm:$0x3] %v1318_v9 }
0x136e   :  { %v1320_v52 = vpop.f32.mrf.mxu0 }
0x1370   :  { %v2450_v8 = vpop.f32.mrf.mxu0 }
0x13cb   :  { %v1030_v55 = vpop.f32.mrf.mxu1 }
0x13cc   :  { %v1036_v57 = vadd.f32 %v1030_v55, %v988_v54 }
0x13cd   :  { %v2409_v58 = vpop.f32.mrf.mxu1 }
0x13ce   :  { %2617 = vtanh.f32 %v1036_v57  ;;  %v2175_v18 = vmul.f32 -1.442695, %v1036_v57 }
0x13cf   :  { %v1033_v59 = vpop.f32.mrf.mxu1 }
0x13d1   :  { %v2410_v61 = vpop.f32.mrf.mxu1 }
0x13d3   :  { %v1409_v62 = vpop.f32.mrf.mxu0 }
0x13d4   :  { %v1410_v63 = vadd.f32 %v3002_v33, %v1409_v62 }
0x13d5   :  { %v2465_v1 = vpop.f32.mrf.mxu0 }
0x13d6   :  { %1415 = vst [vmem:[#allocation3 + $0xc] sm:$0x3] %v1410_v63 }
0x13d7   :  { %v1412_v2 = vpop.f32.mrf.mxu0 }
0x13d9   :  { %v2466_v3 = vpop.f32.mrf.mxu0 }
0x13db   :  { %v2618_v4 = vpop.eup %2617  ;;  %v1509_v6 = vpop.f32.mrf.mxu0 }
0x13dc   :  { %v1515_v11 = vadd.f32 %v1509_v6, %v1462_v5  ;;  %1046 = vrot.lane.b32.xlu0 %v2618_v4, %s2692_s3 }
0x13dd   :  { %v2481_v12 = vpop.f32.mrf.mxu0 }
0x13de   :  { %2619 = vtanh.f32 %v1515_v11  ;;  %v2189_v19 = vmul.f32 -1.442695, %v1515_v11 }
0x13df   :  { %v1512_v13 = vpop.f32.mrf.mxu0  ;;  %2621 = vpow2.f32 %v2175_v18 }
0x13e0   :  { %2623 = vpow2.f32 %v2189_v19 }
0x13e1   :  { %v2482_v16 = vpop.f32.mrf.mxu0 }
0x13eb   :  { %v2620_v10 = vpop.eup %2619 }
0x13ec   :  { %1525 = vrot.lane.b32.xlu1 %v2620_v10, %s2692_s3  ;;  %v2622_v20 = vpop.eup %2621 }
0x13ed   :  { %v1040_v22 = vadd.f32 1.0, %v2622_v20  ;;  %v2624_v23 = vpop.eup %2623 }
0x13ee   :  { %v1519_v24 = vadd.f32 1.0, %v2624_v23 }
0x13ef   :  { %2625 = vrcp.f32 %v1040_v22 }
0x13f0   :  { %2627 = vrcp.f32 %v1519_v24 }
0x13fc   :  { %v2626_v25 = vpop.eup %2625 }
0x13fd   :  { %v2628_v27 = vpop.eup %2627  ;;  %v1044_v30 = vmul.f32 %v2626_v25, %v2967_v21 }
0x13fe   :  { %v1523_v32 = vmul.f32 0.0, %v2628_v27 }
0x144e   :  { %v1047_v53 = vpop.permute.xlu0 %1046 }
0x144f   :  { %v1049_v26 = vmul.f32 %v2626_v25, %v1047_v53 }
0x1451   :  { %1051 = vrot.lane.b32.xlu0 %v1049_v26, %s2693_s23 }
0x145e   :  { %v1526_v28 = vpop.permute.xlu1 %1525 }
0x145f   :  { %v1528_v29 = vmul.f32 %v2628_v27, %v1526_v28 }
0x1461   :  { %1530 = vrot.lane.b32.xlu1 %v1528_v29, %s2693_s23 }
0x14c3   :  { %v1052_v31 = vpop.permute.xlu0 %1051 }
0x14c4   :  { %v1054_v56 = vadd.f32 %v1052_v31, %v1044_v30 }
0x14c6   :  { %2629 = vtanh.f32 %v1054_v56 }
0x14d3   :  { %v2630_v35 = vpop.eup %2629  ;;  %v1531_v36 = vpop.permute.xlu1 %1530 }
0x14d4   :  { %v3045_v37 = vadd.f32 %v1531_v36, %v1523_v32  ;;  %1057 = vrot.lane.b32.xlu0 %v2630_v35, %s2692_s3 }
0x14d6   :  { %2631 = vtanh.f32 %v3045_v37 }
0x14d8   :  { %588 = vrot.lane.b32.xlu0 %v2879_v34, %s2693_s23 }
0x14dc   :  { %904 = vrot.lane.b32.xlu0 %v2939_v60, %s2693_s23 }
0x14e3   :  { %v2632_v38 = vpop.eup %2631 }
0x14e4   :  { %1536 = vrot.lane.b32.xlu1 %v2632_v38, %s2692_s3 }
0x14e8   :  { %746 = vrot.lane.b32.xlu1 %v2909_v17, %s2693_s23 }
0x1546   :  { %v1058_v21 = vpop.permute.xlu0 %1057 }
0x1547   :  { %v1060_v39 = vmul.f32 %v2626_v25, %v1058_v21 }
0x1549   :  { %1062 = vrot.lane.b32.xlu1 %v1060_v39, %s2693_s23 }
0x154a   :  { %v589_v40 = vpop.permute.xlu0 %588 }
0x154b   :  { %592 = vst.msk [vmem:[#allocation2 + $0x2] sm:$0x3] %vm512_vm4, %v589_v40 }
0x154e   :  { %v905_v41 = vpop.permute.xlu0 %904 }
0x154f   :  { %908 = vst.msk [vmem:[#allocation2 + $0xa] sm:$0x3] %vm512_vm4, %v905_v41 }
0x1552   :  { %v1140_v34 = vld [vmem:[#allocation2 + $0x2] sm:$0x3] }
0x1553   :  { %v1141_v42 = vpack.c.bf16 %v1140_v34, %v1140_v34 }
0x1555   :  { %2424 = vmatmul.mubr.msk.bf16.vlgmr.msra.gmra.mxu1 %vm439_vm3, %v1141_v42 }
0x1556   :  { %v1537_v60 = vpop.permute.xlu1 %1536  ;;  %2436 = vmatpush3.bf16.msra.mxu1 %v2951_v14  ;;  %2439 = vmatprep.mubr.msk.bf16.mxu1 %vm2690_vm1, %v2689_v0  ;;  %v1324_v7 = vld [vmem:[#allocation2 + $0xa] sm:$0x3] }
0x1557   :  { %v1539_v17 = vmul.f32 %v2628_v27, %v1537_v60  ;;  %2437 = vmatprep.subr.bf16.mxu1 %v2689_v0  ;;  %v1325_v49 = vpack.c.bf16 %v1324_v7, %v1324_v7 }
0x1559   :  { %v1541_v44 = vpack.c.bf16 %v1539_v17, %v1539_v17 }
0x155a   :  { %v747_v46 = vpop.permute.xlu1 %746  ;;  %2438 = vmatpush3.bf16.msra.mxu1 %v2958_v15 }
0x155b   :  { %750 = vst.msk [vmem:[#allocation2 + $0x6] sm:$0x3] %vm512_vm4, %v747_v46  ;;  %1543 = vrot.lane.b32.xlu0 %v1541_v44, %s2693_s23  ;;  %2451 = vmatprep.subr.bf16.mxu1 %v2689_v0 }
0x1562   :  { %v1232_v47 = vld [vmem:[#allocation2 + $0x6] sm:$0x3] }
0x1563   :  { %v1233_v48 = vpack.c.bf16 %v1232_v47, %v1232_v47 }
0x1565   :  { %2440 = vmatmul.mubr.msk.bf16.vlgmr.msra.gmra.mxu1 %vm439_vm3, %v1233_v48 }
0x1566   :  { %2452 = vmatpush3.bf16.msra.mxu1 %v2951_v14  ;;  %2455 = vmatprep.mubr.msk.bf16.mxu1 %vm2690_vm1, %v2689_v0 }
0x1567   :  { %2453 = vmatprep.subr.bf16.mxu1 %v2689_v0 }
0x156a   :  { %2454 = vmatpush3.bf16.msra.mxu1 %v2958_v15 }
0x156b   :  { %2467 = vmatprep.subr.bf16.mxu1 %v2689_v0 }
0x156d   :  { %2456 = vmatmul.mubr.msk.bf16.vlgmr.msra.gmra.mxu1 %vm439_vm3, %v1325_v49 }
0x156e   :  { %2468 = vmatpush3.bf16.msra.mxu1 %v2951_v14  ;;  %2471 = vmatprep.mubr.msk.bf16.mxu1 %vm2690_vm1, %v2689_v0 }
0x156f   :  { %2469 = vmatprep.subr.bf16.mxu1 %v2689_v0 }
0x1572   :  { %2470 = vmatpush3.bf16.msra.mxu1 %v2958_v15 }
0x1573   :  { %2483 = vmatprep.subr.bf16.mxu1 %v2689_v0 }
0x15bb   :  { %v1063_v50 = vpop.permute.xlu1 %1062 }
0x15bc   :  { %1066 = vst.msk [vmem:[#allocation2 + $0xe] sm:$0x3] %vm512_vm4, %v1063_v50 }
0x15c3   :  { %v1416_v9 = vld [vmem:[#allocation2 + $0xe] sm:$0x3] }
0x15c4   :  { %v1417_v51 = vpack.c.bf16 %v1416_v9, %v1416_v9 }
0x15c6   :  { %2472 = vmatmul.mubr.msk.bf16.vlgmr.msra.gmra.mxu1 %vm439_vm3, %v1417_v51 }
0x15c7   :  { %2484 = vmatpush3.bf16.msra.mxu1 %v3014_v43  ;;  %2487 = vmatprep.mubr.msk.bf16.mxu1 %vm2690_vm1, %v2689_v0 }
0x15c8   :  { %2485 = vmatprep.subr.bf16.mxu1 %v2689_v0 }
0x15cb   :  { %2486 = vmatpush3.bf16.msra.mxu1 %v3023_v45 }
0x15cc   :  { %2499 = vmatprep.subr.bf16.mxu1 %v2689_v0 }
0x15cd   :  { %v1544_v14 = vpop.permute.xlu0 %1543 }
0x15ce   :  { %2488 = vmatmul.mubr.msk.bf16.vlgmr.msra.gmra.mxu1 %vm439_vm3, %v1544_v14 }
0x15cf   :  { %2500 = vmatpush3.bf16.msra.mxu1 %v3014_v43  ;;  %2503 = vmatprep.mubr.msk.bf16.mxu1 %vm2690_vm1, %v2689_v0 }
0x15d0   :  { %2501 = vmatprep.subr.bf16.mxu1 %v2689_v0 }
0x15d3   :  { %2502 = vmatpush3.bf16.msra.mxu1 %v3023_v45 }
0x15d4   :  { %2515 = vmatprep.subr.bf16.mxu1 %v2689_v0 }
0x1615   :  { %v1179_v15 = vpop.f32.mrf.mxu1 }
0x1616   :  { %v1180_v52 = vadd.f32 %v3002_v33, %v1179_v15 }
0x1617   :  { %v2425_v8 = vpop.f32.mrf.mxu1 }
0x1618   :  { %1185 = vst [vmem:[#allocation3 + $0x2] sm:$0x3] %v1180_v52 }
0x1619   :  { %v1182_v54 = vpop.f32.mrf.mxu1 }
0x161b   :  { %v2426_v55 = vpop.f32.mrf.mxu1 }
0x161f   :  { %v1540_v16 = vld [vmem:[#allocation3 + $0x2] sm:$0x3] }
0x1625   :  { %v1271_v57 = vpop.f32.mrf.mxu1 }
0x1626   :  { %v1272_v58 = vadd.f32 %v3002_v33, %v1271_v57 }
0x1627   :  { %v2441_v59 = vpop.f32.mrf.mxu1 }
0x1628   :  { %1277 = vst [vmem:[#allocation3 + $0x6] sm:$0x3] %v1272_v58 }
0x1629   :  { %v1274_v61 = vpop.f32.mrf.mxu1 }
0x162b   :  { %v2442_v62 = vpop.f32.mrf.mxu1 }
0x162d   :  { %v1363_v63 = vpop.f32.mrf.mxu1 }
0x162e   :  { %v1364_v1 = vadd.f32 %v3002_v33, %v1363_v63 }
0x162f   :  { %v2457_v2 = vpop.f32.mrf.mxu1  ;;  %v1686_v52 = vld [vmem:[#allocation3 + $0x6] sm:$0x3] }
0x1630   :  { %1369 = vst [vmem:[#allocation3 + $0xa] sm:$0x3] %v1364_v1 }
0x1631   :  { %v1366_v3 = vpop.f32.mrf.mxu1 }
0x1633   :  { %v2458_v4 = vpop.f32.mrf.mxu1 }
0x1686   :  { %v1455_v5 = vpop.f32.mrf.mxu1 }
0x1687   :  { %v1456_v6 = vadd.f32 %v3002_v33, %v1455_v5 }
0x1688   :  { %v2473_v11 = vpop.f32.mrf.mxu1 }
0x1689   :  { %1461 = vst [vmem:[#allocation3 + $0xe] sm:$0x3] %v1456_v6 }
0x168a   :  { %v1458_v12 = vpop.f32.mrf.mxu1 }
0x168c   :  { %v2474_v13 = vpop.f32.mrf.mxu1 }
0x168e   :  { %v1582_v10 = vpop.f32.mrf.mxu1 }
0x168f   :  { %v1588_v18 = vadd.f32 %v1582_v10, %v1540_v16 }
0x1690   :  { %v2489_v19 = vpop.f32.mrf.mxu1 }
0x1691   :  { %2633 = vtanh.f32 %v1588_v18  ;;  %v2191_v24 = vmul.f32 -1.442695, %v1588_v18  ;;  %v1759_v18 = vld [vmem:[#allocation3 + $0x8] sm:$0x3] }
0x1692   :  { %v1585_v20 = vpop.f32.mrf.mxu1 }
0x1693   :  { %2635 = vpow2.f32 %v2191_v24 }
0x1694   :  { %v2490_v22 = vpop.f32.mrf.mxu1 }
0x169e   :  { %v2634_v23 = vpop.eup %2633 }
0x169f   :  { %1598 = vrot.lane.b32.xlu1 %v2634_v23, %s2692_s3 }
0x16a0   :  { %v2636_v25 = vpop.eup %2635 }
0x16a1   :  { %v1592_v53 = vadd.f32 1.0, %v2636_v25 }
0x16a3   :  { %2637 = vrcp.f32 %v1592_v53 }
0x16b0   :  { %v2638_v33 = vpop.eup %2637 }
0x16b1   :  { %v1596_v28 = vmul.f32 %v2638_v33, %v3045_v37  ;;  %v1613_v37 = vld [vmem:[#allocation3 + $0x4] sm:$0x3] }
0x1711   :  { %v1599_v26 = vpop.permute.xlu1 %1598 }
0x1712   :  { %v1601_v27 = vmul.f32 %v2638_v33, %v1599_v26 }
0x1714   :  { %1603 = vrot.lane.b32.xlu0 %v1601_v27, %s2693_s23 }
0x1786   :  { %v1604_v29 = vpop.permute.xlu0 %1603 }
0x1787   :  { %v1606_v30 = vadd.f32 %v1604_v29, %v1596_v28 }
0x1789   :  { %2639 = vtanh.f32 %v1606_v30 }
0x1796   :  { %v2640_v31 = vpop.eup %2639 }
0x1797   :  { %1609 = vrot.lane.b32.xlu1 %v2640_v31, %s2692_s3 }
0x1809   :  { %v1610_v56 = vpop.permute.xlu1 %1609 }
0x180a   :  { %v1612_v32 = vmul.f32 %v2638_v33, %v1610_v56 }
0x180c   :  { %v1614_v35 = vpack.c.bf16 %v1612_v32, %v1612_v32 }
0x180e   :  { %1616 = vrot.lane.b32.xlu0 %v1614_v35, %s2693_s23 }
0x1880   :  { %v1617_v36 = vpop.permute.xlu0 %1616 }
0x1881   :  { %2496 = vmatmul.mubr.msk.bf16.vlgmr.msra.gmra.mxu0 %vm439_vm3, %v1617_v36 }
0x1882   :  { %2508 = vmatpush3.bf16.msra.mxu0 %v3014_v43  ;;  %2511 = vmatprep.mubr.msk.bf16.mxu0 %vm2690_vm1, %v2689_v0 }
0x1883   :  { %2509 = vmatprep.subr.bf16.mxu0 %v2689_v0 }
0x1886   :  { %2510 = vmatpush3.bf16.msra.mxu0 %v3023_v45 }
0x1887   :  { %2523 = vmatprep.subr.bf16.mxu0 %v2689_v0 }
0x1941   :  { %v1655_v38 = vpop.f32.mrf.mxu0 }
0x1942   :  { %v1661_v21 = vadd.f32 %v1655_v38, %v1613_v37 }
0x1943   :  { %v2497_v39 = vpop.f32.mrf.mxu0 }
0x1944   :  { %2641 = vtanh.f32 %v1661_v21  ;;  %v2193_v42 = vmul.f32 -1.442695, %v1661_v21  ;;  %v1832_v21 = vld [vmem:[#allocation3 + $0xa] sm:$0x3] }
0x1945   :  { %v1658_v40 = vpop.f32.mrf.mxu0 }
0x1946   :  { %2643 = vpow2.f32 %v2193_v42 }
0x1947   :  { %v2498_v41 = vpop.f32.mrf.mxu0 }
0x1951   :  { %v2642_v34 = vpop.eup %2641 }
0x1952   :  { %1671 = vrot.lane.b32.xlu1 %v2642_v34, %s2692_s3 }
0x1953   :  { %v2644_v60 = vpop.eup %2643 }
0x1954   :  { %v1665_v17 = vadd.f32 1.0, %v2644_v60 }
0x1956   :  { %2645 = vrcp.f32 %v1665_v17 }
0x1963   :  { %v2646_v44 = vpop.eup %2645 }
0x1964   :  { %v1669_v48 = vmul.f32 %v2646_v44, %v1606_v30 }
0x19c4   :  { %v1672_v46 = vpop.permute.xlu1 %1671 }
0x19c5   :  { %v1674_v47 = vmul.f32 %v2646_v44, %v1672_v46 }
0x19c7   :  { %1676 = vrot.lane.b32.xlu0 %v1674_v47, %s2693_s23 }
0x1a39   :  { %v1677_v7 = vpop.permute.xlu0 %1676 }
0x1a3a   :  { %v1679_v49 = vadd.f32 %v1677_v7, %v1669_v48 }
0x1a3c   :  { %2647 = vtanh.f32 %v1679_v49 }
0x1a49   :  { %v2648_v50 = vpop.eup %2647 }
0x1a4a   :  { %1682 = vrot.lane.b32.xlu1 %v2648_v50, %s2692_s3 }
0x1abc   :  { %v1683_v9 = vpop.permute.xlu1 %1682 }
0x1abd   :  { %v1685_v51 = vmul.f32 %v2646_v44, %v1683_v9 }
0x1abf   :  { %v1687_v14 = vpack.c.bf16 %v1685_v51, %v1685_v51 }
0x1ac1   :  { %1689 = vrot.lane.b32.xlu0 %v1687_v14, %s2693_s23 }
0x1b33   :  { %v1690_v15 = vpop.permute.xlu0 %1689 }
0x1b34   :  { %2504 = vmatmul.mubr.msk.bf16.vlgmr.msra.gmra.mxu1 %vm439_vm3, %v1690_v15 }
0x1b35   :  { %2516 = vmatpush3.bf16.msra.mxu1 %v3014_v43  ;;  %2519 = vmatprep.mubr.msk.bf16.mxu1 %vm2690_vm1, %v2689_v0 }
0x1b36   :  { %2517 = vmatprep.subr.bf16.mxu1 %v2689_v0 }
0x1b39   :  { %2518 = vmatpush3.bf16.msra.mxu1 %v3023_v45 }
0x1b3a   :  { %2531 = vmatprep.subr.bf16.mxu1 %v2689_v0 }
0x1bf4   :  { %v1728_v8 = vpop.f32.mrf.mxu1 }
0x1bf5   :  { %v1734_v54 = vadd.f32 %v1728_v8, %v1686_v52  ;;  %v1905_v52 = vld [vmem:[#allocation3 + $0xc] sm:$0x3] }
0x1bf6   :  { %v2505_v55 = vpop.f32.mrf.mxu1 }
0x1bf7   :  { %2649 = vtanh.f32 %v1734_v54  ;;  %v2195_v61 = vmul.f32 -1.442695, %v1734_v54 }
0x1bf8   :  { %v1731_v57 = vpop.f32.mrf.mxu1 }
0x1bf9   :  { %2651 = vpow2.f32 %v2195_v61 }
0x1bfa   :  { %v2506_v58 = vpop.f32.mrf.mxu1 }
0x1c04   :  { %v2650_v59 = vpop.eup %2649 }
0x1c05   :  { %1744 = vrot.lane.b32.xlu1 %v2650_v59, %s2692_s3 }
0x1c06   :  { %v2652_v62 = vpop.eup %2651 }
0x1c07   :  { %v1738_v63 = vadd.f32 1.0, %v2652_v62 }
0x1c09   :  { %2653 = vrcp.f32 %v1738_v63 }
0x1c16   :  { %v2654_v1 = vpop.eup %2653 }
0x1c17   :  { %v1742_v4 = vmul.f32 %v2654_v1, %v1679_v49 }
0x1c77   :  { %v1745_v2 = vpop.permute.xlu1 %1744 }
0x1c78   :  { %v1747_v3 = vmul.f32 %v2654_v1, %v1745_v2 }
0x1c7a   :  { %1749 = vrot.lane.b32.xlu0 %v1747_v3, %s2693_s23 }
0x1cec   :  { %v1750_v5 = vpop.permute.xlu0 %1749 }
0x1ced   :  { %v1752_v6 = vadd.f32 %v1750_v5, %v1742_v4 }
0x1cef   :  { %2655 = vtanh.f32 %v1752_v6 }
0x1cfc   :  { %v2656_v11 = vpop.eup %2655 }
0x1cfd   :  { %1755 = vrot.lane.b32.xlu1 %v2656_v11, %s2692_s3 }
0x1d6f   :  { %v1756_v12 = vpop.permute.xlu1 %1755 }
0x1d70   :  { %v1758_v13 = vmul.f32 %v2654_v1, %v1756_v12 }
0x1d72   :  { %v1760_v16 = vpack.c.bf16 %v1758_v13, %v1758_v13 }
0x1d74   :  { %1762 = vrot.lane.b32.xlu0 %v1760_v16, %s2693_s23 }
0x1de6   :  { %v1763_v10 = vpop.permute.xlu0 %1762 }
0x1de7   :  { %2512 = vmatmul.mubr.msk.bf16.vlgmr.msra.gmra.mxu0 %vm439_vm3, %v1763_v10 }
0x1de8   :  { %2524 = vmatpush3.bf16.msra.mxu0 %v3014_v43  ;;  %2527 = vmatprep.mubr.msk.bf16.mxu0 %vm2690_vm1, %v2689_v0 }
0x1de9   :  { %2525 = vmatprep.subr.bf16.mxu0 %v2689_v0 }
0x1dec   :  { %2526 = vmatpush3.bf16.msra.mxu0 %v3023_v45 }
0x1ded   :  { %2539 = vmatprep.subr.mxu0 %v2689_v0 }
0x1ea7   :  { %v1801_v19 = vpop.f32.mrf.mxu0 }
0x1ea8   :  { %v1807_v20 = vadd.f32 %v1801_v19, %v1759_v18  ;;  %v1978_v18 = vld [vmem:[#allocation3 + $0xe] sm:$0x3] }
0x1ea9   :  { %v2513_v22 = vpop.f32.mrf.mxu0 }
0x1eaa   :  { %2657 = vtanh.f32 %v1807_v20  ;;  %v2197_v53 = vmul.f32 -1.442695, %v1807_v20 }
0x1eab   :  { %v1804_v23 = vpop.f32.mrf.mxu0 }
0x1eac   :  { %2659 = vpow2.f32 %v2197_v53 }
0x1ead   :  { %v2514_v24 = vpop.f32.mrf.mxu0 }
0x1eb7   :  { %v2658_v25 = vpop.eup %2657 }
0x1eb8   :  { %1817 = vrot.lane.b32.xlu1 %v2658_v25, %s2692_s3 }
0x1eb9   :  { %v2660_v33 = vpop.eup %2659 }
0x1eba   :  { %v1811_v26 = vadd.f32 1.0, %v2660_v33 }
0x1ebc   :  { %2661 = vrcp.f32 %v1811_v26 }
0x1ec9   :  { %v2662_v27 = vpop.eup %2661 }
0x1eca   :  { %v1815_v30 = vmul.f32 %v2662_v27, %v1752_v6 }
0x1f2a   :  { %v1818_v28 = vpop.permute.xlu1 %1817 }
0x1f2b   :  { %v1820_v29 = vmul.f32 %v2662_v27, %v1818_v28 }
0x1f2d   :  { %1822 = vrot.lane.b32.xlu0 %v1820_v29, %s2693_s23 }
0x1f9f   :  { %v1823_v31 = vpop.permute.xlu0 %1822 }
0x1fa0   :  { %v1825_v56 = vadd.f32 %v1823_v31, %v1815_v30 }
0x1fa2   :  { %2663 = vtanh.f32 %v1825_v56 }
0x1faf   :  { %v2664_v32 = vpop.eup %2663 }
0x1fb0   :  { %1828 = vrot.lane.b32.xlu1 %v2664_v32, %s2692_s3  ;;  %v2054_v32 = vld [vmem:[%s3190_s7 + $0x18] sm:$0xff] }
0x2022   :  { %v1829_v35 = vpop.permute.xlu1 %1828 }
0x2023   :  { %v1831_v36 = vmul.f32 %v2662_v27, %v1829_v35  ;;  %v2053_v35 = vld [vmem:[%s3190_s7 + $0x10] sm:$0xff] }
0x2025   :  { %v1833_v37 = vpack.c.bf16 %v1831_v36, %v1831_v36  ;;  %v2052_v36 = vld [vmem:[%s3190_s7 + $0x8] sm:$0xff] }
0x2027   :  { %1835 = vrot.lane.b32.xlu0 %v1833_v37, %s2693_s23  ;;  %v2051_v37 = vld [vmem:[%s3190_s7] sm:$0xff] }
0x2099   :  { %v1836_v38 = vpop.permute.xlu0 %1835 }
0x209a   :  { %2520 = vmatmul.mubr.msk.bf16.vlgmr.msra.gmra.mxu1 %vm439_vm3, %v1836_v38 }
0x209b   :  { %2532 = vmatpush3.bf16.msra.mxu1 %v3014_v43  ;;  %2535 = vmatprep.mubr.msk.bf16.mxu1 %vm2690_vm1, %v2689_v0 }
0x209c   :  { %2533 = vmatprep.subr.bf16.mxu1 %v2689_v0 }
0x209f   :  { %2534 = vmatpush3.bf16.msra.mxu1 %v3023_v45 }
0x215a   :  { %v1874_v39 = vpop.f32.mrf.mxu1 }
0x215b   :  { %v1880_v40 = vadd.f32 %v1874_v39, %v1832_v21  ;;  %v14_v21 = vstv %s3191_s8 }
0x215c   :  { %v2521_v41 = vpop.f32.mrf.mxu1  ;;  %15 = vst [vmem:[#allocation4] sm:$0x1] %v14_v21 }
0x215d   :  { %2665 = vtanh.f32 %v1880_v40  ;;  %v2199_v17 = vmul.f32 -1.442695, %v1880_v40 }
0x215e   :  { %v1877_v34 = vpop.f32.mrf.mxu1 }
0x215f   :  { %2667 = vpow2.f32 %v2199_v17 }
0x2160   :  { %v2522_v42 = vpop.f32.mrf.mxu1 }
0x2163   :  { %v2204_v34 = vld [vmem:[#allocation4] ss:$0 sm:$0xff] }
0x216a   :  { %v2666_v60 = vpop.eup %2665 }
0x216b   :  { %1890 = vrot.lane.b32.xlu1 %v2666_v60, %s2692_s3 }
0x216c   :  { %v2668_v43 = vpop.eup %2667 }
0x216d   :  { %v1884_v44 = vadd.f32 1.0, %v2668_v43 }
0x216f   :  { %2669 = vrcp.f32 %v1884_v44 }
0x217c   :  { %v2670_v46 = vpop.eup %2669 }
0x217d   :  { %v1888_v45 = vmul.f32 %v2670_v46, %v1825_v56 }
0x21dd   :  { %v1891_v47 = vpop.permute.xlu1 %1890 }
0x21de   :  { %v1893_v48 = vmul.f32 %v2670_v46, %v1891_v47 }
0x21e0   :  { %1895 = vrot.lane.b32.xlu0 %v1893_v48, %s2693_s23 }
0x2252   :  { %v1896_v7 = vpop.permute.xlu0 %1895 }
0x2253   :  { %v1898_v49 = vadd.f32 %v1896_v7, %v1888_v45 }
0x2255   :  { %2671 = vtanh.f32 %v1898_v49 }
0x2262   :  { %v2672_v50 = vpop.eup %2671 }
0x2263   :  { %1901 = vrot.lane.b32.xlu1 %v2672_v50, %s2692_s3 }
0x22d5   :  { %v1902_v9 = vpop.permute.xlu1 %1901 }
0x22d6   :  { %v1904_v51 = vmul.f32 %v2670_v46, %v1902_v9 }
0x22d8   :  { %v1906_v14 = vpack.c.bf16 %v1904_v51, %v1904_v51 }
0x22da   :  { %1908 = vrot.lane.b32.xlu0 %v1906_v14, %s2693_s23 }
0x234c   :  { %v1909_v15 = vpop.permute.xlu0 %1908 }
0x234d   :  { %2528 = vmatmul.mubr.msk.bf16.vlgmr.msra.gmra.mxu0 %vm439_vm3, %v1909_v15 }
0x234e   :  { %2547 = vmatprep.mubr.msk.f32.mxu0 %vm2690_vm1, %v2689_v0  ;;  %2540 = vmatpush3.msra.mxu0 %v2054_v32 }
0x234f   :  { %2541 = vmatprep.subr.mxu0 %v2689_v0 }
0x2350   :  { %2542 = vmatpush3.msra.mxu0 %v2053_v35 }
0x2351   :  { %2543 = vmatprep.subr.mxu0 %v2689_v0 }
0x2352   :  { %2544 = vmatpush3.msra.mxu0 %v2052_v36 }
0x2353   :  { %2545 = vmatprep.subr.mxu0 %v2689_v0 }
0x2354   :  { %2546 = vmatpush3.msra.mxu0 %v2051_v37 }
0x240d   :  { %v1947_v8 = vpop.f32.mrf.mxu0 }
0x240e   :  { %v1953_v54 = vadd.f32 %v1947_v8, %v1905_v52 }
0x240f   :  { %v2529_v55 = vpop.f32.mrf.mxu0 }
0x2410   :  { %2673 = vtanh.f32 %v1953_v54  ;;  %v2201_v61 = vmul.f32 -1.442695, %v1953_v54 }
0x2411   :  { %v1950_v57 = vpop.f32.mrf.mxu0 }
0x2412   :  { %2675 = vpow2.f32 %v2201_v61 }
0x2413   :  { %v2530_v58 = vpop.f32.mrf.mxu0 }
0x241d   :  { %v2674_v59 = vpop.eup %2673 }
0x241e   :  { %1963 = vrot.lane.b32.xlu1 %v2674_v59, %s2692_s3 }
0x241f   :  { %v2676_v62 = vpop.eup %2675 }
0x2420   :  { %v1957_v63 = vadd.f32 1.0, %v2676_v62 }
0x2422   :  { %2677 = vrcp.f32 %v1957_v63 }
0x242f   :  { %v2678_v1 = vpop.eup %2677 }
0x2430   :  { %v1961_v4 = vmul.f32 %v2678_v1, %v1898_v49 }
0x2490   :  { %v1964_v2 = vpop.permute.xlu1 %1963 }
0x2491   :  { %v1966_v3 = vmul.f32 %v2678_v1, %v1964_v2 }
0x2493   :  { %1968 = vrot.lane.b32.xlu0 %v1966_v3, %s2693_s23 }
0x2505   :  { %v1969_v5 = vpop.permute.xlu0 %1968 }
0x2506   :  { %v1971_v6 = vadd.f32 %v1969_v5, %v1961_v4 }
0x2508   :  { %2679 = vtanh.f32 %v1971_v6 }
0x2515   :  { %v2680_v11 = vpop.eup %2679 }
0x2516   :  { %1974 = vrot.lane.b32.xlu1 %v2680_v11, %s2692_s3 }
0x2588   :  { %v1975_v12 = vpop.permute.xlu1 %1974 }
0x2589   :  { %v1977_v13 = vmul.f32 %v2678_v1, %v1975_v12 }
0x258b   :  { %v1979_v16 = vpack.c.bf16 %v1977_v13, %v1977_v13 }
0x258d   :  { %1981 = vrot.lane.b32.xlu0 %v1979_v16, %s2693_s23 }
0x25ff   :  { %v1982_v10 = vpop.permute.xlu0 %1981 }
0x2600   :  { %2536 = vmatmul.mubr.msk.bf16.vlgmr.msra.gmra.mxu1 %vm439_vm3, %v1982_v10 }
0x26c0   :  { %v2020_v19 = vpop.f32.mrf.mxu1 }
0x26c1   :  { %v2026_v20 = vadd.f32 %v2020_v19, %v1978_v18 }
0x26c2   :  { %v2537_v22 = vpop.f32.mrf.mxu1 }
0x26c3   :  { %2681 = vtanh.f32 %v2026_v20  ;;  %v2203_v53 = vmul.f32 -1.442695, %v2026_v20 }
0x26c4   :  { %v2023_v23 = vpop.f32.mrf.mxu1 }
0x26c5   :  { %2683 = vpow2.f32 %v2203_v53 }
0x26c6   :  { %v2538_v24 = vpop.f32.mrf.mxu1 }
0x26d0   :  { %v2682_v25 = vpop.eup %2681 }
0x26d1   :  { %2036 = vrot.lane.b32.xlu1 %v2682_v25, %s2692_s3 }
0x26d2   :  { %v2684_v33 = vpop.eup %2683 }
0x26d3   :  { %v2030_v26 = vadd.f32 1.0, %v2684_v33 }
0x26d5   :  { %2685 = vrcp.f32 %v2030_v26 }
0x26e2   :  { %v2686_v27 = vpop.eup %2685 }
0x26e3   :  { %v2034_v30 = vmul.f32 %v2686_v27, %v1971_v6 }
0x2743   :  { %v2037_v28 = vpop.permute.xlu1 %2036 }
0x2744   :  { %v2039_v29 = vmul.f32 %v2686_v27, %v2037_v28 }
0x2746   :  { %2041 = vrot.lane.b32.xlu0 %v2039_v29, %s2693_s23 }
0x27b8   :  { %v2042_v31 = vpop.permute.xlu0 %2041 }
0x27b9   :  { %v2044_v56 = vadd.f32 %v2042_v31, %v2034_v30 }
0x27bb   :  { %2687 = vtanh.f32 %v2044_v56 }
0x27c8   :  { %v2688_v38 = vpop.eup %2687 }
0x27c9   :  { %2047 = vrot.lane.b32.xlu1 %v2688_v38, %s2692_s3 }
0x283b   :  { %v2048_v39 = vpop.permute.xlu1 %2047 }
0x283c   :  { %v2050_v40 = vmul.f32 %v2686_v27, %v2048_v39 }
0x283e   :  { %2063 = vrot.lane.b32.xlu0 %v2050_v40, %s2693_s23 }
0x28b0   :  { %v2064_v41 = vpop.permute.xlu0 %2063 }
0x28b1   :  { %2548 = vmatmul.mubr.msk.f32.vlgmr.msra.gmra.mxu0 %vm439_vm3, %v2064_v41 }
0x2971   :  { %v2133_v42 = vpop.f32.mrf.mxu0 }
0x2972   :  { %v2134_v0 = vadd.f32 %v2204_v34, %v2133_v42 }
0x2973   :  { %v2549_v60 = vpop.f32.mrf.mxu0 }
0x2974   :  { %2138 = vst.msk [vmem:[%s3192_s9] sm:$0x3] %vm2137_vm5, %v2134_v0 }

</bundles_post_ra>
